<compile_context>
chip_gen: v7x
topology: tpu7x:2x2x1
jax: 0.10.0
libtpu: 0.0.40
codegen_flags: <defaults>
</compile_context>

<pallas_src>
import math
import jax
import jax.numpy as jnp
from jax.experimental import pallas as pl
from jax.experimental.pallas import tpu as pltpu

# --- hyperparameters (config.CONFIG.model stand-ins, kept small) -------------
D_MODEL    = 32
NHEAD      = 4
DIM_FF     = 64          # nn.TransformerEncoderLayer dim_feedforward (small)
ENC_LAYERS = 2
NTOKEN     = 100
NTOK_PAD   = 128         # token-id axis padded to a full lane tile
SEQ        = 8
BATCH      = 2
LN_EPS     = 1e-5


def clusterformer_kernel(tok_ref, emb_ref, pe_ref, pin_ref, pout_ref,
                         wqkv_ref, bqkv_ref, wo_ref, bo_ref,
                         g1_ref, be1_ref, w1_ref, b1_ref, w2_ref, b2_ref,
                         g2_ref, be2_ref, out_ref):
    """Embedding + PE + all ENC_LAYERS encoder layers, whole batch, one call.

    tok_ref : (S*B, 1) int32, rows in natural (seq, batch) order.
    emb_ref : (NTOK_PAD, D) f32, rows already scaled by sqrt(d_model).
    pe_ref  : (S*B, D) f32 positional encodings, rows in batch-major order.
    pin_ref/pout_ref : (S*B, S*B) f32 permutation matrices (natural <-> batch-major).
    Weight refs are stacked per layer along axis 0 and pre-transposed to
    (in, out) so every projection is `x @ W`; matmul weights are bf16,
    biases / LayerNorm params are f32.
    Post-LN ordering (norm_first=False): x = LN1(x + MHA(x)); x = LN2(x + FFN(x))
    """
    B, S, H = BATCH, SEQ, NHEAD
    N = B * S
    NT, D = emb_ref.shape
    L = wqkv_ref.shape[0]
    dh = D // H
    inv_d = 1.0 / D
    f32, bf16 = jnp.float32, jnp.bfloat16

    # ---- embedding gather as an exact one-hot matmul (sqrt(D) folded into table)
    tok = tok_ref[...]                                               # (N, 1) int32
    onehot = (tok == jax.lax.broadcasted_iota(jnp.int32, (N, NT), 1)).astype(f32)
    x_sm = jnp.dot(onehot, emb_ref[...], preferred_element_type=f32)  # (N, D), (s,b)-major

    # ---- reorder rows to batch-major with a permutation matmul (MXU, exact),
    #      then add the (already batch-major-tiled) positional encoding.
    x2d = jnp.dot(pin_ref[...], x_sm, preferred_element_type=f32) + pe_ref[...]

    def layernorm(v, gamma, beta):
        mu = jnp.sum(v, axis=-1, keepdims=True) * inv_d
        d_ = v - mu
        var = jnp.sum(d_ * d_, axis=-1, keepdims=True) * inv_d
        return d_ * jax.lax.rsqrt(var + LN_EPS) * gamma + beta

    for l in range(L):                                   # static unroll (L=2)
        wqkv, bqkv = wqkv_ref[l], bqkv_ref[l]            # (D,3D) bf16, (1,3D) f32
        wo,   bo   = wo_ref[l],   bo_ref[l]              # (D,D)  bf16, (1,D)  f32
        g1,   be1  = g1_ref[l],   be1_ref[l]
        w1,   b1   = w1_ref[l],   b1_ref[l]              # (D,F)  bf16, (1,F)  f32
        w2,   b2   = w2_ref[l],   b2_ref[l]              # (F,D)  bf16, (1,D)  f32
        g2,   be2  = g2_ref[l],   be2_ref[l]

        # --- fused QKV projection: one (N,D)@(D,3D) bf16 matmul, f32 accumulate.
        #     1/sqrt(dh) is pre-folded into the Q columns on the host.
        qkv = jnp.dot(x2d.astype(bf16), wqkv, preferred_element_type=f32) + bqkv
        qkv3 = qkv.reshape(B, S, 3 * D)                  # free leading-dim split

        # --- gather all heads into ONE (H*B, S, dh) batch (slice + stack along
        #     the leading axis: guaranteed lowering, feeds a single fused
        #     attention instead of 4 per-head compute chains).
        q_all = jnp.concatenate(
            [qkv3[:, :, h * dh:(h + 1) * dh] for h in range(H)], axis=0)
        k_all = jnp.concatenate(
            [qkv3[:, :, D + h * dh:D + (h + 1) * dh] for h in range(H)], axis=0)
        v_all = jnp.concatenate(
            [qkv3[:, :, 2 * D + h * dh:2 * D + (h + 1) * dh] for h in range(H)], axis=0)

        # --- single batched score einsum + single softmax + single PV einsum.
        s_all = jnp.einsum('bqd,bkd->bqk', q_all.astype(bf16), k_all.astype(bf16),
                           preferred_element_type=f32)            # (H*B, S, S)
        s_all = s_all - jnp.max(s_all, axis=-1, keepdims=True)
        p_all = jnp.exp(s_all)
        p_all = p_all * pl.reciprocal(jnp.sum(p_all, axis=-1, keepdims=True),
                                      approx=True)                # EUP slot
        o_all = jnp.einsum('bqk,bkd->bqd', p_all.astype(bf16), v_all.astype(bf16),
                           preferred_element_type=f32)            # (H*B, S, dh)

        # --- concat heads along lanes -> ONE K=D out-projection matmul.
        o_cat = jnp.concatenate([o_all[h * B:(h + 1) * B] for h in range(H)],
                                axis=-1)                          # (B, S, D)
        attn = jnp.dot(o_cat.reshape(N, D).astype(bf16), wo,
                       preferred_element_type=f32) + bo           # (N, D)

        x2d = layernorm(x2d + attn, g1, be1)

        # --- feed-forward (linear -> ReLU -> linear), bf16 MXU / f32 vector math
        h1 = jnp.maximum(
            jnp.dot(x2d.astype(bf16), w1, preferred_element_type=f32) + b1, 0.0)
        ff = jnp.dot(h1.astype(bf16), w2, preferred_element_type=f32) + b2
        x2d = layernorm(x2d + ff, g2, be2)

    # --- back to natural (seq, batch) row order via the inverse permutation
    #     matmul; one full-slab store.
    out_ref[...] = jnp.dot(pout_ref[...], x2d,
                           preferred_element_type=f32).astype(out_ref.dtype)


def run_clusterformer(tok_col, emb_pad, pe_bm, p_in, p_out, stacked):
    """tok_col: (S*B, 1) int32.  Returns (S*B, D_MODEL) f32 in (seq, batch) row order."""
    N, D = pe_bm.shape
    inputs = [tok_col, emb_pad, pe_bm, p_in, p_out] + list(stacked)
    vmem = pl.BlockSpec(memory_space=pltpu.MemorySpace.VMEM)
    return pl.pallas_call(
        clusterformer_kernel,
        out_shape=jax.ShapeDtypeStruct((N, D), jnp.float32),
        in_specs=[vmem] * len(inputs),
        out_specs=vmem,
        cost_estimate=pl.CostEstimate(flops=720_000, transcendentals=1_300,
                                      bytes_accessed=58_000),
    )(*inputs)


def positional_encoding_table(max_len, d_model):
    pos = jnp.arange(max_len, dtype=jnp.float32)[:, None]
    div = jnp.exp(jnp.arange(0, d_model, 2, dtype=jnp.float32)
                  * (-math.log(10000.0) / d_model))
    pe = jnp.zeros((max_len, d_model), dtype=jnp.float32)
    pe = pe.at[:, 0::2].set(jnp.sin(pos * div))
    pe = pe.at[:, 1::2].set(jnp.cos(pos * div))
    return pe                                            # (max_len, d_model)


def init_params(key):
    """Build all host-side constants once (outside jit): padded/scaled embedding
    table, batch-major-tiled PE, row-permutation matrices, bf16 weight stacks."""
    keys = jax.random.split(key, 1 + ENC_LAYERS * 6)
    emb_table = jax.random.normal(keys[0], (NTOKEN, D_MODEL), jnp.float32)

    # Embedding table: fold sqrt(d_model), pad token axis to a full 128 lane tile.
    emb_pad = jnp.zeros((NTOK_PAD, D_MODEL), jnp.float32)
    emb_pad = emb_pad.at[:NTOKEN].set(emb_table * math.sqrt(D_MODEL))

    # Positional encoding, tiled to batch-major row order (row i = b*S + s -> pe[s]).
    pe_s = positional_encoding_table(64, D_MODEL)[:SEQ]             # (S, D)
    pe_bm = jnp.tile(pe_s, (BATCH, 1))                               # (B*S, D)

    # Row-permutation matrices: natural (s,b) order <-> batch-major (b,s) order.
    N = BATCH * SEQ
    i_idx = jnp.arange(N)                                            # i = b*S + s
    j_idx = (i_idx % SEQ) * BATCH + (i_idx // SEQ)                   # j = s*B + b
    p_in = jnp.zeros((N, N), jnp.float32).at[i_idx, j_idx].set(1.0)  # x_bm = p_in @ x_sm
    p_out = p_in.T                                                   # x_sm = p_out @ x_bm

    def nrm(k, shape, scale=0.05):
        return jax.random.normal(k, shape, jnp.float32) * scale

    scale_q = 1.0 / math.sqrt(D_MODEL // NHEAD)
    wqkv_l, bqkv_l, wo_l, bo_l = [], [], [], []
    g1_l, be1_l, w1_l, b1_l, w2_l, b2_l, g2_l, be2_l = ([] for _ in range(8))
    ki = 1
    for _ in range(ENC_LAYERS):
        # PyTorch convention: weights are (out_features, in_features).
        wq = nrm(keys[ki + 0], (D_MODEL, D_MODEL))
        wk = nrm(keys[ki + 1], (D_MODEL, D_MODEL))
        wv = nrm(keys[ki + 2], (D_MODEL, D_MODEL))
        wo = nrm(keys[ki + 3], (D_MODEL, D_MODEL))
        w1 = nrm(keys[ki + 4], (DIM_FF, D_MODEL))
        w2 = nrm(keys[ki + 5], (D_MODEL, DIM_FF))
        ki += 6
        # Pre-transpose to (in, out), fold 1/sqrt(dh) into Q, fuse QKV, cast to bf16.
        wqkv_l.append(jnp.concatenate([wq.T * scale_q, wk.T, wv.T],
                                      axis=1).astype(jnp.bfloat16))   # (D, 3D)
        bqkv_l.append(jnp.zeros((1, 3 * D_MODEL), jnp.float32))        # (q-part pre-scaled; zero here)
        wo_l.append(wo.T.astype(jnp.bfloat16))                         # (D, D)
        bo_l.append(jnp.zeros((1, D_MODEL), jnp.float32))
        g1_l.append(jnp.ones((1, D_MODEL), jnp.float32))
        be1_l.append(jnp.zeros((1, D_MODEL), jnp.float32))
        w1_l.append(w1.T.astype(jnp.bfloat16))                         # (D, F)
        b1_l.append(jnp.zeros((1, DIM_FF), jnp.float32))
        w2_l.append(w2.T.astype(jnp.bfloat16))                         # (F, D)
        b2_l.append(jnp.zeros((1, D_MODEL), jnp.float32))
        g2_l.append(jnp.ones((1, D_MODEL), jnp.float32))
        be2_l.append(jnp.zeros((1, D_MODEL), jnp.float32))

    stack = lambda xs: jnp.stack(xs, axis=0)            # leading layer axis
    stacked = [stack(wqkv_l), stack(bqkv_l), stack(wo_l), stack(bo_l),
               stack(g1_l), stack(be1_l), stack(w1_l), stack(b1_l),
               stack(w2_l), stack(b2_l), stack(g2_l), stack(be2_l)]
    return emb_pad, pe_bm, p_in, p_out, stacked


@jax.jit
def clusterformer_forward(tokens, emb_pad, pe_bm, p_in, p_out, stacked):
    """tokens: (S, B) int32 -> output (S, B, D) float32 (matches PyTorch).
    Both reshapes below are layout-preserving bitcasts: all real work
    (gather, PE add, reorderings, encoder layers) happens inside pallas_call."""
    S, B = tokens.shape
    tok_col = tokens.reshape(S * B, 1)                  # natural (s, b) row order
    out2d = run_clusterformer(tok_col, emb_pad, pe_bm, p_in, p_out, stacked)
    return out2d.reshape(S, B, D_MODEL)


if __name__ == "__main__":
    key = jax.random.PRNGKey(0)
    k_tok, k_par = jax.random.split(key)
    tokens = jax.random.randint(k_tok, (SEQ, BATCH), 0, NTOKEN, dtype=jnp.int32)

    emb_pad, pe_bm, p_in, p_out, stacked = init_params(k_par)

    out = clusterformer_forward(tokens, emb_pad, pe_bm, p_in, p_out, stacked)
    out = jax.block_until_ready(out)
    assert out.shape == (SEQ, BATCH, D_MODEL)
    assert bool(jnp.all(jnp.isfinite(out)))
    print("KERNEL_OK")
</pallas_src>

<mosaic_0001>
module attributes {stable_mosaic.version = 11 : i64} {
  func.func @clusterformer_kernel(%arg0: memref<16x1xi32, #tpu.memory_space<vmem>>, %arg1: memref<128x32xf32, #tpu.memory_space<vmem>>, %arg2: memref<16x32xf32, #tpu.memory_space<vmem>>, %arg3: memref<16x16xf32, #tpu.memory_space<vmem>>, %arg4: memref<16x16xf32, #tpu.memory_space<vmem>>, %arg5: memref<2x32x96xbf16, #tpu.memory_space<vmem>>, %arg6: memref<2x1x96xf32, #tpu.memory_space<vmem>>, %arg7: memref<2x32x32xbf16, #tpu.memory_space<vmem>>, %arg8: memref<2x1x32xf32, #tpu.memory_space<vmem>>, %arg9: memref<2x1x32xf32, #tpu.memory_space<vmem>>, %arg10: memref<2x1x32xf32, #tpu.memory_space<vmem>>, %arg11: memref<2x32x64xbf16, #tpu.memory_space<vmem>>, %arg12: memref<2x1x64xf32, #tpu.memory_space<vmem>>, %arg13: memref<2x64x32xbf16, #tpu.memory_space<vmem>>, %arg14: memref<2x1x32xf32, #tpu.memory_space<vmem>>, %arg15: memref<2x1x32xf32, #tpu.memory_space<vmem>>, %arg16: memref<2x1x32xf32, #tpu.memory_space<vmem>>, %arg17: memref<16x32xf32, #tpu.memory_space<vmem>>) attributes {dimension_semantics = [], scalar_prefetch = 0 : i64, scratch_operands = 0 : i64, tpu.core_type = #tpu.core_type<tc>} {
    %c0 = arith.constant 0 : index
    %c0_0 = arith.constant 0 : index
    %0 = vector.load %arg0[%c0, %c0_0] : memref<16x1xi32, #tpu.memory_space<vmem>>, vector<16x1xi32>
    %1 = tpu.iota {dimensions = array<i32: 1>} : vector<16x128xi32>
    %2 = vector.broadcast %0 : vector<16x1xi32> to vector<16x128xi32>
    %3 = arith.cmpi eq, %2, %1 : vector<16x128xi32>
    %4 = arith.extui %3 : vector<16x128xi1> to vector<16x128xi32>
    %5 = arith.sitofp %4 : vector<16x128xi32> to vector<16x128xf32>
    %c0_1 = arith.constant 0 : index
    %c0_2 = arith.constant 0 : index
    %6 = vector.load %arg1[%c0_1, %c0_2] : memref<128x32xf32, #tpu.memory_space<vmem>>, vector<128x32xf32>
    %cst = arith.constant dense<0.000000e+00> : vector<16x32xf32>
    %7 = tpu.matmul %5, %6, %cst {dimension_numbers = #tpu.dot_dimension_numbers<[1], [0], [0], [1], [0, 0, 1, 1], [], []>} : vector<16x128xf32>, vector<128x32xf32>, vector<16x32xf32> -> vector<16x32xf32>
    %c0_3 = arith.constant 0 : index
    %c0_4 = arith.constant 0 : index
    %8 = vector.load %arg3[%c0_3, %c0_4] : memref<16x16xf32, #tpu.memory_space<vmem>>, vector<16x16xf32>
    %cst_5 = arith.constant dense<0.000000e+00> : vector<16x32xf32>
    %9 = tpu.matmul %8, %7, %cst_5 {dimension_numbers = #tpu.dot_dimension_numbers<[1], [0], [0], [1], [0, 0, 1, 1], [], []>} : vector<16x16xf32>, vector<16x32xf32>, vector<16x32xf32> -> vector<16x32xf32>
    %c0_6 = arith.constant 0 : index
    %c0_7 = arith.constant 0 : index
    %10 = vector.load %arg2[%c0_6, %c0_7] : memref<16x32xf32, #tpu.memory_space<vmem>>, vector<16x32xf32>
    %11 = arith.addf %9, %10 : vector<16x32xf32>
    %c0_8 = arith.constant 0 : index
    %c0_9 = arith.constant 0 : index
    %c0_10 = arith.constant 0 : index
    %12 = vector.load %arg5[%c0_8, %c0_9, %c0_10] : memref<2x32x96xbf16, #tpu.memory_space<vmem>>, vector<1x32x96xbf16>
    %13 = vector.shape_cast %12 : vector<1x32x96xbf16> to vector<32x96xbf16>
    %c0_11 = arith.constant 0 : index
    %c0_12 = arith.constant 0 : index
    %c0_13 = arith.constant 0 : index
    %14 = vector.load %arg6[%c0_11, %c0_12, %c0_13] : memref<2x1x96xf32, #tpu.memory_space<vmem>>, vector<1x1x96xf32>
    %15 = vector.shape_cast %14 : vector<1x1x96xf32> to vector<1x96xf32>
    %c0_14 = arith.constant 0 : index
    %c0_15 = arith.constant 0 : index
    %c0_16 = arith.constant 0 : index
    %16 = vector.load %arg7[%c0_14, %c0_15, %c0_16] : memref<2x32x32xbf16, #tpu.memory_space<vmem>>, vector<1x32x32xbf16>
    %17 = vector.shape_cast %16 : vector<1x32x32xbf16> to vector<32x32xbf16>
    %c0_17 = arith.constant 0 : index
    %c0_18 = arith.constant 0 : index
    %c0_19 = arith.constant 0 : index
    %18 = vector.load %arg8[%c0_17, %c0_18, %c0_19] : memref<2x1x32xf32, #tpu.memory_space<vmem>>, vector<1x1x32xf32>
    %19 = vector.shape_cast %18 : vector<1x1x32xf32> to vector<1x32xf32>
    %c0_20 = arith.constant 0 : index
    %c0_21 = arith.constant 0 : index
    %c0_22 = arith.constant 0 : index
    %20 = vector.load %arg9[%c0_20, %c0_21, %c0_22] : memref<2x1x32xf32, #tpu.memory_space<vmem>>, vector<1x1x32xf32>
    %21 = vector.shape_cast %20 : vector<1x1x32xf32> to vector<1x32xf32>
    %c0_23 = arith.constant 0 : index
    %c0_24 = arith.constant 0 : index
    %c0_25 = arith.constant 0 : index
    %22 = vector.load %arg10[%c0_23, %c0_24, %c0_25] : memref<2x1x32xf32, #tpu.memory_space<vmem>>, vector<1x1x32xf32>
    %23 = vector.shape_cast %22 : vector<1x1x32xf32> to vector<1x32xf32>
    %c0_26 = arith.constant 0 : index
    %c0_27 = arith.constant 0 : index
    %c0_28 = arith.constant 0 : index
    %24 = vector.load %arg11[%c0_26, %c0_27, %c0_28] : memref<2x32x64xbf16, #tpu.memory_space<vmem>>, vector<1x32x64xbf16>
    %25 = vector.shape_cast %24 : vector<1x32x64xbf16> to vector<32x64xbf16>
    %c0_29 = arith.constant 0 : index
    %c0_30 = arith.constant 0 : index
    %c0_31 = arith.constant 0 : index
    %26 = vector.load %arg12[%c0_29, %c0_30, %c0_31] : memref<2x1x64xf32, #tpu.memory_space<vmem>>, vector<1x1x64xf32>
    %27 = vector.shape_cast %26 : vector<1x1x64xf32> to vector<1x64xf32>
    %c0_32 = arith.constant 0 : index
    %c0_33 = arith.constant 0 : index
    %c0_34 = arith.constant 0 : index
    %28 = vector.load %arg13[%c0_32, %c0_33, %c0_34] : memref<2x64x32xbf16, #tpu.memory_space<vmem>>, vector<1x64x32xbf16>
    %29 = vector.shape_cast %28 : vector<1x64x32xbf16> to vector<64x32xbf16>
    %c0_35 = arith.constant 0 : index
    %c0_36 = arith.constant 0 : index
    %c0_37 = arith.constant 0 : index
    %30 = vector.load %arg14[%c0_35, %c0_36, %c0_37] : memref<2x1x32xf32, #tpu.memory_space<vmem>>, vector<1x1x32xf32>
    %31 = vector.shape_cast %30 : vector<1x1x32xf32> to vector<1x32xf32>
    %c0_38 = arith.constant 0 : index
    %c0_39 = arith.constant 0 : index
    %c0_40 = arith.constant 0 : index
    %32 = vector.load %arg15[%c0_38, %c0_39, %c0_40] : memref<2x1x32xf32, #tpu.memory_space<vmem>>, vector<1x1x32xf32>
    %33 = vector.shape_cast %32 : vector<1x1x32xf32> to vector<1x32xf32>
    %c0_41 = arith.constant 0 : index
    %c0_42 = arith.constant 0 : index
    %c0_43 = arith.constant 0 : index
    %34 = vector.load %arg16[%c0_41, %c0_42, %c0_43] : memref<2x1x32xf32, #tpu.memory_space<vmem>>, vector<1x1x32xf32>
    %35 = vector.shape_cast %34 : vector<1x1x32xf32> to vector<1x32xf32>
    %36 = arith.truncf %11 : vector<16x32xf32> to vector<16x32xbf16>
    %cst_44 = arith.constant dense<0.000000e+00> : vector<16x96xf32>
    %37 = tpu.matmul %36, %13, %cst_44 {dimension_numbers = #tpu.dot_dimension_numbers<[1], [0], [0], [1], [0, 0, 1, 1], [], []>} : vector<16x32xbf16>, vector<32x96xbf16>, vector<16x96xf32> -> vector<16x96xf32>
    %38 = vector.broadcast %15 : vector<1x96xf32> to vector<16x96xf32>
    %39 = arith.addf %37, %38 : vector<16x96xf32>
    %40 = vector.shape_cast %39 : vector<16x96xf32> to vector<2x8x96xf32>
    %41 = vector.extract_strided_slice %40 {offsets = [0, 0, 0], sizes = [2, 8, 8], strides = [1, 1, 1]} : vector<2x8x96xf32> to vector<2x8x8xf32>
    %42 = vector.extract_strided_slice %40 {offsets = [0, 0, 8], sizes = [2, 8, 8], strides = [1, 1, 1]} : vector<2x8x96xf32> to vector<2x8x8xf32>
    %43 = vector.extract_strided_slice %40 {offsets = [0, 0, 16], sizes = [2, 8, 8], strides = [1, 1, 1]} : vector<2x8x96xf32> to vector<2x8x8xf32>
    %44 = vector.extract_strided_slice %40 {offsets = [0, 0, 24], sizes = [2, 8, 8], strides = [1, 1, 1]} : vector<2x8x96xf32> to vector<2x8x8xf32>
    %45 = tpu.concatenate %41, %42, %43, %44 in 0 : vector<2x8x8xf32>, vector<2x8x8xf32>, vector<2x8x8xf32>, vector<2x8x8xf32> -> vector<8x8x8xf32>
    %46 = vector.extract_strided_slice %40 {offsets = [0, 0, 32], sizes = [2, 8, 8], strides = [1, 1, 1]} : vector<2x8x96xf32> to vector<2x8x8xf32>
    %47 = vector.extract_strided_slice %40 {offsets = [0, 0, 40], sizes = [2, 8, 8], strides = [1, 1, 1]} : vector<2x8x96xf32> to vector<2x8x8xf32>
    %48 = vector.extract_strided_slice %40 {offsets = [0, 0, 48], sizes = [2, 8, 8], strides = [1, 1, 1]} : vector<2x8x96xf32> to vector<2x8x8xf32>
    %49 = vector.extract_strided_slice %40 {offsets = [0, 0, 56], sizes = [2, 8, 8], strides = [1, 1, 1]} : vector<2x8x96xf32> to vector<2x8x8xf32>
    %50 = tpu.concatenate %46, %47, %48, %49 in 0 : vector<2x8x8xf32>, vector<2x8x8xf32>, vector<2x8x8xf32>, vector<2x8x8xf32> -> vector<8x8x8xf32>
    %51 = vector.extract_strided_slice %40 {offsets = [0, 0, 64], sizes = [2, 8, 8], strides = [1, 1, 1]} : vector<2x8x96xf32> to vector<2x8x8xf32>
    %52 = vector.extract_strided_slice %40 {offsets = [0, 0, 72], sizes = [2, 8, 8], strides = [1, 1, 1]} : vector<2x8x96xf32> to vector<2x8x8xf32>
    %53 = vector.extract_strided_slice %40 {offsets = [0, 0, 80], sizes = [2, 8, 8], strides = [1, 1, 1]} : vector<2x8x96xf32> to vector<2x8x8xf32>
    %54 = vector.extract_strided_slice %40 {offsets = [0, 0, 88], sizes = [2, 8, 8], strides = [1, 1, 1]} : vector<2x8x96xf32> to vector<2x8x8xf32>
    %55 = tpu.concatenate %51, %52, %53, %54 in 0 : vector<2x8x8xf32>, vector<2x8x8xf32>, vector<2x8x8xf32>, vector<2x8x8xf32> -> vector<8x8x8xf32>
    %56 = arith.truncf %45 : vector<8x8x8xf32> to vector<8x8x8xbf16>
    %57 = arith.truncf %50 : vector<8x8x8xf32> to vector<8x8x8xbf16>
    "tpu.trace_start"() <{level = 10 : i32, message = "bqd,bkd->bqk"}> : () -> ()
    %cst_45 = arith.constant dense<0.000000e+00> : vector<8x8x8xf32>
    %58 = tpu.matmul %56, %57, %cst_45 {dimension_numbers = #tpu.dot_dimension_numbers<[2], [2], [1], [1], [0, 0, 0, 1, 1, 1], [0], [0]>} : vector<8x8x8xbf16>, vector<8x8x8xbf16>, vector<8x8x8xf32> -> vector<8x8x8xf32>
    "tpu.trace_stop"() : () -> ()
    %cst_46 = arith.constant dense<0xFF800000> : vector<8x8xf32>
    %59 = vector.multi_reduction <maximumf>, %58, %cst_46 [2] : vector<8x8x8xf32> to vector<8x8xf32>
    %60 = vector.shape_cast %59 : vector<8x8xf32> to vector<8x8x1xf32>
    %61 = vector.broadcast %60 : vector<8x8x1xf32> to vector<8x8x8xf32>
    %62 = arith.subf %58, %61 : vector<8x8x8xf32>
    %63 = math.exp %62 : vector<8x8x8xf32>
    %cst_47 = arith.constant dense<0.000000e+00> : vector<8x8xf32>
    %64 = vector.multi_reduction <add>, %63, %cst_47 [2] : vector<8x8x8xf32> to vector<8x8xf32>
    %65 = vector.shape_cast %64 : vector<8x8xf32> to vector<8x8x1xf32>
    %66 = tpu.reciprocal %65 {approx = true} : vector<8x8x1xf32> -> vector<8x8x1xf32>
    %67 = vector.broadcast %66 : vector<8x8x1xf32> to vector<8x8x8xf32>
    %68 = arith.mulf %63, %67 : vector<8x8x8xf32>
    %69 = arith.truncf %68 : vector<8x8x8xf32> to vector<8x8x8xbf16>
    %70 = arith.truncf %55 : vector<8x8x8xf32> to vector<8x8x8xbf16>
    "tpu.trace_start"() <{level = 10 : i32, message = "bqk,bkd->bqd"}> : () -> ()
    %cst_48 = arith.constant dense<0.000000e+00> : vector<8x8x8xf32>
    %71 = tpu.matmul %69, %70, %cst_48 {dimension_numbers = #tpu.dot_dimension_numbers<[2], [1], [1], [2], [0, 0, 0, 1, 1, 2], [0], [0]>} : vector<8x8x8xbf16>, vector<8x8x8xbf16>, vector<8x8x8xf32> -> vector<8x8x8xf32>
    "tpu.trace_stop"() : () -> ()
    %72 = vector.extract_strided_slice %71 {offsets = [0, 0, 0], sizes = [2, 8, 8], strides = [1, 1, 1]} : vector<8x8x8xf32> to vector<2x8x8xf32>
    %73 = vector.extract_strided_slice %71 {offsets = [2, 0, 0], sizes = [2, 8, 8], strides = [1, 1, 1]} : vector<8x8x8xf32> to vector<2x8x8xf32>
    %74 = vector.extract_strided_slice %71 {offsets = [4, 0, 0], sizes = [2, 8, 8], strides = [1, 1, 1]} : vector<8x8x8xf32> to vector<2x8x8xf32>
    %75 = vector.extract_strided_slice %71 {offsets = [6, 0, 0], sizes = [2, 8, 8], strides = [1, 1, 1]} : vector<8x8x8xf32> to vector<2x8x8xf32>
    %76 = tpu.concatenate %72, %73, %74, %75 in 2 : vector<2x8x8xf32>, vector<2x8x8xf32>, vector<2x8x8xf32>, vector<2x8x8xf32> -> vector<2x8x32xf32>
    %77 = vector.shape_cast %76 : vector<2x8x32xf32> to vector<16x32xf32>
    %78 = arith.truncf %77 : vector<16x32xf32> to vector<16x32xbf16>
    %cst_49 = arith.constant dense<0.000000e+00> : vector<16x32xf32>
    %79 = tpu.matmul %78, %17, %cst_49 {dimension_numbers = #tpu.dot_dimension_numbers<[1], [0], [0], [1], [0, 0, 1, 1], [], []>} : vector<16x32xbf16>, vector<32x32xbf16>, vector<16x32xf32> -> vector<16x32xf32>
    %80 = vector.broadcast %19 : vector<1x32xf32> to vector<16x32xf32>
    %81 = arith.addf %79, %80 : vector<16x32xf32>
    %82 = arith.addf %11, %81 : vector<16x32xf32>
    %cst_50 = arith.constant dense<0.000000e+00> : vector<16xf32>
    %83 = vector.multi_reduction <add>, %82, %cst_50 [1] : vector<16x32xf32> to vector<16xf32>
    %84 = vector.shape_cast %83 : vector<16xf32> to vector<16x1xf32>
    %cst_51 = arith.constant 3.125000e-02 : f32
    %85 = vector.broadcast %cst_51 : f32 to vector<16x1xf32>
    %86 = arith.mulf %84, %85 : vector<16x1xf32>
    %87 = vector.broadcast %86 : vector<16x1xf32> to vector<16x32xf32>
    %88 = arith.subf %82, %87 : vector<16x32xf32>
    %89 = arith.mulf %88, %88 : vector<16x32xf32>
    %cst_52 = arith.constant dense<0.000000e+00> : vector<16xf32>
    %90 = vector.multi_reduction <add>, %89, %cst_52 [1] : vector<16x32xf32> to vector<16xf32>
    %91 = vector.shape_cast %90 : vector<16xf32> to vector<16x1xf32>
    %cst_53 = arith.constant 3.125000e-02 : f32
    %92 = vector.broadcast %cst_53 : f32 to vector<16x1xf32>
    %93 = arith.mulf %91, %92 : vector<16x1xf32>
    %cst_54 = arith.constant 9.99999974E-6 : f32
    %94 = vector.broadcast %cst_54 : f32 to vector<16x1xf32>
    %95 = arith.addf %93, %94 : vector<16x1xf32>
    %96 = math.rsqrt %95 : vector<16x1xf32>
    %97 = vector.broadcast %96 : vector<16x1xf32> to vector<16x32xf32>
    %98 = arith.mulf %88, %97 : vector<16x32xf32>
    %99 = vector.broadcast %21 : vector<1x32xf32> to vector<16x32xf32>
    %100 = arith.mulf %98, %99 : vector<16x32xf32>
    %101 = vector.broadcast %23 : vector<1x32xf32> to vector<16x32xf32>
    %102 = arith.addf %100, %101 : vector<16x32xf32>
    %103 = arith.truncf %102 : vector<16x32xf32> to vector<16x32xbf16>
    %cst_55 = arith.constant dense<0.000000e+00> : vector<16x64xf32>
    %104 = tpu.matmul %103, %25, %cst_55 {dimension_numbers = #tpu.dot_dimension_numbers<[1], [0], [0], [1], [0, 0, 1, 1], [], []>} : vector<16x32xbf16>, vector<32x64xbf16>, vector<16x64xf32> -> vector<16x64xf32>
    %105 = vector.broadcast %27 : vector<1x64xf32> to vector<16x64xf32>
    %106 = arith.addf %104, %105 : vector<16x64xf32>
    %cst_56 = arith.constant 0.000000e+00 : f32
    %107 = vector.broadcast %cst_56 : f32 to vector<16x64xf32>
    %108 = arith.maximumf %106, %107 : vector<16x64xf32>
    %109 = arith.truncf %108 : vector<16x64xf32> to vector<16x64xbf16>
    %cst_57 = arith.constant dense<0.000000e+00> : vector<16x32xf32>
    %110 = tpu.matmul %109, %29, %cst_57 {dimension_numbers = #tpu.dot_dimension_numbers<[1], [0], [0], [1], [0, 0, 1, 1], [], []>} : vector<16x64xbf16>, vector<64x32xbf16>, vector<16x32xf32> -> vector<16x32xf32>
    %111 = vector.broadcast %31 : vector<1x32xf32> to vector<16x32xf32>
    %112 = arith.addf %110, %111 : vector<16x32xf32>
    %113 = arith.addf %102, %112 : vector<16x32xf32>
    %cst_58 = arith.constant dense<0.000000e+00> : vector<16xf32>
    %114 = vector.multi_reduction <add>, %113, %cst_58 [1] : vector<16x32xf32> to vector<16xf32>
    %115 = vector.shape_cast %114 : vector<16xf32> to vector<16x1xf32>
    %cst_59 = arith.constant 3.125000e-02 : f32
    %116 = vector.broadcast %cst_59 : f32 to vector<16x1xf32>
    %117 = arith.mulf %115, %116 : vector<16x1xf32>
    %118 = vector.broadcast %117 : vector<16x1xf32> to vector<16x32xf32>
    %119 = arith.subf %113, %118 : vector<16x32xf32>
    %120 = arith.mulf %119, %119 : vector<16x32xf32>
    %cst_60 = arith.constant dense<0.000000e+00> : vector<16xf32>
    %121 = vector.multi_reduction <add>, %120, %cst_60 [1] : vector<16x32xf32> to vector<16xf32>
    %122 = vector.shape_cast %121 : vector<16xf32> to vector<16x1xf32>
    %cst_61 = arith.constant 3.125000e-02 : f32
    %123 = vector.broadcast %cst_61 : f32 to vector<16x1xf32>
    %124 = arith.mulf %122, %123 : vector<16x1xf32>
    %cst_62 = arith.constant 9.99999974E-6 : f32
    %125 = vector.broadcast %cst_62 : f32 to vector<16x1xf32>
    %126 = arith.addf %124, %125 : vector<16x1xf32>
    %127 = math.rsqrt %126 : vector<16x1xf32>
    %128 = vector.broadcast %127 : vector<16x1xf32> to vector<16x32xf32>
    %129 = arith.mulf %119, %128 : vector<16x32xf32>
    %130 = vector.broadcast %33 : vector<1x32xf32> to vector<16x32xf32>
    %131 = arith.mulf %129, %130 : vector<16x32xf32>
    %132 = vector.broadcast %35 : vector<1x32xf32> to vector<16x32xf32>
    %133 = arith.addf %131, %132 : vector<16x32xf32>
    %c1 = arith.constant 1 : index
    %c0_63 = arith.constant 0 : index
    %c0_64 = arith.constant 0 : index
    %134 = vector.load %arg5[%c1, %c0_63, %c0_64] : memref<2x32x96xbf16, #tpu.memory_space<vmem>>, vector<1x32x96xbf16>
    %135 = vector.shape_cast %134 : vector<1x32x96xbf16> to vector<32x96xbf16>
    %c1_65 = arith.constant 1 : index
    %c0_66 = arith.constant 0 : index
    %c0_67 = arith.constant 0 : index
    %136 = vector.load %arg6[%c1_65, %c0_66, %c0_67] : memref<2x1x96xf32, #tpu.memory_space<vmem>>, vector<1x1x96xf32>
    %137 = vector.shape_cast %136 : vector<1x1x96xf32> to vector<1x96xf32>
    %c1_68 = arith.constant 1 : index
    %c0_69 = arith.constant 0 : index
    %c0_70 = arith.constant 0 : index
    %138 = vector.load %arg7[%c1_68, %c0_69, %c0_70] : memref<2x32x32xbf16, #tpu.memory_space<vmem>>, vector<1x32x32xbf16>
    %139 = vector.shape_cast %138 : vector<1x32x32xbf16> to vector<32x32xbf16>
    %c1_71 = arith.constant 1 : index
    %c0_72 = arith.constant 0 : index
    %c0_73 = arith.constant 0 : index
    %140 = vector.load %arg8[%c1_71, %c0_72, %c0_73] : memref<2x1x32xf32, #tpu.memory_space<vmem>>, vector<1x1x32xf32>
    %141 = vector.shape_cast %140 : vector<1x1x32xf32> to vector<1x32xf32>
    %c1_74 = arith.constant 1 : index
    %c0_75 = arith.constant 0 : index
    %c0_76 = arith.constant 0 : index
    %142 = vector.load %arg9[%c1_74, %c0_75, %c0_76] : memref<2x1x32xf32, #tpu.memory_space<vmem>>, vector<1x1x32xf32>
    %143 = vector.shape_cast %142 : vector<1x1x32xf32> to vector<1x32xf32>
    %c1_77 = arith.constant 1 : index
    %c0_78 = arith.constant 0 : index
    %c0_79 = arith.constant 0 : index
    %144 = vector.load %arg10[%c1_77, %c0_78, %c0_79] : memref<2x1x32xf32, #tpu.memory_space<vmem>>, vector<1x1x32xf32>
    %145 = vector.shape_cast %144 : vector<1x1x32xf32> to vector<1x32xf32>
    %c1_80 = arith.constant 1 : index
    %c0_81 = arith.constant 0 : index
    %c0_82 = arith.constant 0 : index
    %146 = vector.load %arg11[%c1_80, %c0_81, %c0_82] : memref<2x32x64xbf16, #tpu.memory_space<vmem>>, vector<1x32x64xbf16>
    %147 = vector.shape_cast %146 : vector<1x32x64xbf16> to vector<32x64xbf16>
    %c1_83 = arith.constant 1 : index
    %c0_84 = arith.constant 0 : index
    %c0_85 = arith.constant 0 : index
    %148 = vector.load %arg12[%c1_83, %c0_84, %c0_85] : memref<2x1x64xf32, #tpu.memory_space<vmem>>, vector<1x1x64xf32>
    %149 = vector.shape_cast %148 : vector<1x1x64xf32> to vector<1x64xf32>
    %c1_86 = arith.constant 1 : index
    %c0_87 = arith.constant 0 : index
    %c0_88 = arith.constant 0 : index
    %150 = vector.load %arg13[%c1_86, %c0_87, %c0_88] : memref<2x64x32xbf16, #tpu.memory_space<vmem>>, vector<1x64x32xbf16>
    %151 = vector.shape_cast %150 : vector<1x64x32xbf16> to vector<64x32xbf16>
    %c1_89 = arith.constant 1 : index
    %c0_90 = arith.constant 0 : index
    %c0_91 = arith.constant 0 : index
    %152 = vector.load %arg14[%c1_89, %c0_90, %c0_91] : memref<2x1x32xf32, #tpu.memory_space<vmem>>, vector<1x1x32xf32>
    %153 = vector.shape_cast %152 : vector<1x1x32xf32> to vector<1x32xf32>
    %c1_92 = arith.constant 1 : index
    %c0_93 = arith.constant 0 : index
    %c0_94 = arith.constant 0 : index
    %154 = vector.load %arg15[%c1_92, %c0_93, %c0_94] : memref<2x1x32xf32, #tpu.memory_space<vmem>>, vector<1x1x32xf32>
    %155 = vector.shape_cast %154 : vector<1x1x32xf32> to vector<1x32xf32>
    %c1_95 = arith.constant 1 : index
    %c0_96 = arith.constant 0 : index
    %c0_97 = arith.constant 0 : index
    %156 = vector.load %arg16[%c1_95, %c0_96, %c0_97] : memref<2x1x32xf32, #tpu.memory_space<vmem>>, vector<1x1x32xf32>
    %157 = vector.shape_cast %156 : vector<1x1x32xf32> to vector<1x32xf32>
    %158 = arith.truncf %133 : vector<16x32xf32> to vector<16x32xbf16>
    %cst_98 = arith.constant dense<0.000000e+00> : vector<16x96xf32>
    %159 = tpu.matmul %158, %135, %cst_98 {dimension_numbers = #tpu.dot_dimension_numbers<[1], [0], [0], [1], [0, 0, 1, 1], [], []>} : vector<16x32xbf16>, vector<32x96xbf16>, vector<16x96xf32> -> vector<16x96xf32>
    %160 = vector.broadcast %137 : vector<1x96xf32> to vector<16x96xf32>
    %161 = arith.addf %159, %160 : vector<16x96xf32>
    %162 = vector.shape_cast %161 : vector<16x96xf32> to vector<2x8x96xf32>
    %163 = vector.extract_strided_slice %162 {offsets = [0, 0, 0], sizes = [2, 8, 8], strides = [1, 1, 1]} : vector<2x8x96xf32> to vector<2x8x8xf32>
    %164 = vector.extract_strided_slice %162 {offsets = [0, 0, 8], sizes = [2, 8, 8], strides = [1, 1, 1]} : vector<2x8x96xf32> to vector<2x8x8xf32>
    %165 = vector.extract_strided_slice %162 {offsets = [0, 0, 16], sizes = [2, 8, 8], strides = [1, 1, 1]} : vector<2x8x96xf32> to vector<2x8x8xf32>
    %166 = vector.extract_strided_slice %162 {offsets = [0, 0, 24], sizes = [2, 8, 8], strides = [1, 1, 1]} : vector<2x8x96xf32> to vector<2x8x8xf32>
    %167 = tpu.concatenate %163, %164, %165, %166 in 0 : vector<2x8x8xf32>, vector<2x8x8xf32>, vector<2x8x8xf32>, vector<2x8x8xf32> -> vector<8x8x8xf32>
    %168 = vector.extract_strided_slice %162 {offsets = [0, 0, 32], sizes = [2, 8, 8], strides = [1, 1, 1]} : vector<2x8x96xf32> to vector<2x8x8xf32>
    %169 = vector.extract_strided_slice %162 {offsets = [0, 0, 40], sizes = [2, 8, 8], strides = [1, 1, 1]} : vector<2x8x96xf32> to vector<2x8x8xf32>
    %170 = vector.extract_strided_slice %162 {offsets = [0, 0, 48], sizes = [2, 8, 8], strides = [1, 1, 1]} : vector<2x8x96xf32> to vector<2x8x8xf32>
    %171 = vector.extract_strided_slice %162 {offsets = [0, 0, 56], sizes = [2, 8, 8], strides = [1, 1, 1]} : vector<2x8x96xf32> to vector<2x8x8xf32>
    %172 = tpu.concatenate %168, %169, %170, %171 in 0 : vector<2x8x8xf32>, vector<2x8x8xf32>, vector<2x8x8xf32>, vector<2x8x8xf32> -> vector<8x8x8xf32>
    %173 = vector.extract_strided_slice %162 {offsets = [0, 0, 64], sizes = [2, 8, 8], strides = [1, 1, 1]} : vector<2x8x96xf32> to vector<2x8x8xf32>
    %174 = vector.extract_strided_slice %162 {offsets = [0, 0, 72], sizes = [2, 8, 8], strides = [1, 1, 1]} : vector<2x8x96xf32> to vector<2x8x8xf32>
    %175 = vector.extract_strided_slice %162 {offsets = [0, 0, 80], sizes = [2, 8, 8], strides = [1, 1, 1]} : vector<2x8x96xf32> to vector<2x8x8xf32>
    %176 = vector.extract_strided_slice %162 {offsets = [0, 0, 88], sizes = [2, 8, 8], strides = [1, 1, 1]} : vector<2x8x96xf32> to vector<2x8x8xf32>
    %177 = tpu.concatenate %173, %174, %175, %176 in 0 : vector<2x8x8xf32>, vector<2x8x8xf32>, vector<2x8x8xf32>, vector<2x8x8xf32> -> vector<8x8x8xf32>
    %178 = arith.truncf %167 : vector<8x8x8xf32> to vector<8x8x8xbf16>
    %179 = arith.truncf %172 : vector<8x8x8xf32> to vector<8x8x8xbf16>
    "tpu.trace_start"() <{level = 10 : i32, message = "bqd,bkd->bqk"}> : () -> ()
    %cst_99 = arith.constant dense<0.000000e+00> : vector<8x8x8xf32>
    %180 = tpu.matmul %178, %179, %cst_99 {dimension_numbers = #tpu.dot_dimension_numbers<[2], [2], [1], [1], [0, 0, 0, 1, 1, 1], [0], [0]>} : vector<8x8x8xbf16>, vector<8x8x8xbf16>, vector<8x8x8xf32> -> vector<8x8x8xf32>
    "tpu.trace_stop"() : () -> ()
    %cst_100 = arith.constant dense<0xFF800000> : vector<8x8xf32>
    %181 = vector.multi_reduction <maximumf>, %180, %cst_100 [2] : vector<8x8x8xf32> to vector<8x8xf32>
    %182 = vector.shape_cast %181 : vector<8x8xf32> to vector<8x8x1xf32>
    %183 = vector.broadcast %182 : vector<8x8x1xf32> to vector<8x8x8xf32>
    %184 = arith.subf %180, %183 : vector<8x8x8xf32>
    %185 = math.exp %184 : vector<8x8x8xf32>
    %cst_101 = arith.constant dense<0.000000e+00> : vector<8x8xf32>
    %186 = vector.multi_reduction <add>, %185, %cst_101 [2] : vector<8x8x8xf32> to vector<8x8xf32>
    %187 = vector.shape_cast %186 : vector<8x8xf32> to vector<8x8x1xf32>
    %188 = tpu.reciprocal %187 {approx = true} : vector<8x8x1xf32> -> vector<8x8x1xf32>
    %189 = vector.broadcast %188 : vector<8x8x1xf32> to vector<8x8x8xf32>
    %190 = arith.mulf %185, %189 : vector<8x8x8xf32>
    %191 = arith.truncf %190 : vector<8x8x8xf32> to vector<8x8x8xbf16>
    %192 = arith.truncf %177 : vector<8x8x8xf32> to vector<8x8x8xbf16>
    "tpu.trace_start"() <{level = 10 : i32, message = "bqk,bkd->bqd"}> : () -> ()
    %cst_102 = arith.constant dense<0.000000e+00> : vector<8x8x8xf32>
    %193 = tpu.matmul %191, %192, %cst_102 {dimension_numbers = #tpu.dot_dimension_numbers<[2], [1], [1], [2], [0, 0, 0, 1, 1, 2], [0], [0]>} : vector<8x8x8xbf16>, vector<8x8x8xbf16>, vector<8x8x8xf32> -> vector<8x8x8xf32>
    "tpu.trace_stop"() : () -> ()
    %194 = vector.extract_strided_slice %193 {offsets = [0, 0, 0], sizes = [2, 8, 8], strides = [1, 1, 1]} : vector<8x8x8xf32> to vector<2x8x8xf32>
    %195 = vector.extract_strided_slice %193 {offsets = [2, 0, 0], sizes = [2, 8, 8], strides = [1, 1, 1]} : vector<8x8x8xf32> to vector<2x8x8xf32>
    %196 = vector.extract_strided_slice %193 {offsets = [4, 0, 0], sizes = [2, 8, 8], strides = [1, 1, 1]} : vector<8x8x8xf32> to vector<2x8x8xf32>
    %197 = vector.extract_strided_slice %193 {offsets = [6, 0, 0], sizes = [2, 8, 8], strides = [1, 1, 1]} : vector<8x8x8xf32> to vector<2x8x8xf32>
    %198 = tpu.concatenate %194, %195, %196, %197 in 2 : vector<2x8x8xf32>, vector<2x8x8xf32>, vector<2x8x8xf32>, vector<2x8x8xf32> -> vector<2x8x32xf32>
    %199 = vector.shape_cast %198 : vector<2x8x32xf32> to vector<16x32xf32>
    %200 = arith.truncf %199 : vector<16x32xf32> to vector<16x32xbf16>
    %cst_103 = arith.constant dense<0.000000e+00> : vector<16x32xf32>
    %201 = tpu.matmul %200, %139, %cst_103 {dimension_numbers = #tpu.dot_dimension_numbers<[1], [0], [0], [1], [0, 0, 1, 1], [], []>} : vector<16x32xbf16>, vector<32x32xbf16>, vector<16x32xf32> -> vector<16x32xf32>
    %202 = vector.broadcast %141 : vector<1x32xf32> to vector<16x32xf32>
    %203 = arith.addf %201, %202 : vector<16x32xf32>
    %204 = arith.addf %133, %203 : vector<16x32xf32>
    %cst_104 = arith.constant dense<0.000000e+00> : vector<16xf32>
    %205 = vector.multi_reduction <add>, %204, %cst_104 [1] : vector<16x32xf32> to vector<16xf32>
    %206 = vector.shape_cast %205 : vector<16xf32> to vector<16x1xf32>
    %cst_105 = arith.constant 3.125000e-02 : f32
    %207 = vector.broadcast %cst_105 : f32 to vector<16x1xf32>
    %208 = arith.mulf %206, %207 : vector<16x1xf32>
    %209 = vector.broadcast %208 : vector<16x1xf32> to vector<16x32xf32>
    %210 = arith.subf %204, %209 : vector<16x32xf32>
    %211 = arith.mulf %210, %210 : vector<16x32xf32>
    %cst_106 = arith.constant dense<0.000000e+00> : vector<16xf32>
    %212 = vector.multi_reduction <add>, %211, %cst_106 [1] : vector<16x32xf32> to vector<16xf32>
    %213 = vector.shape_cast %212 : vector<16xf32> to vector<16x1xf32>
    %cst_107 = arith.constant 3.125000e-02 : f32
    %214 = vector.broadcast %cst_107 : f32 to vector<16x1xf32>
    %215 = arith.mulf %213, %214 : vector<16x1xf32>
    %cst_108 = arith.constant 9.99999974E-6 : f32
    %216 = vector.broadcast %cst_108 : f32 to vector<16x1xf32>
    %217 = arith.addf %215, %216 : vector<16x1xf32>
    %218 = math.rsqrt %217 : vector<16x1xf32>
    %219 = vector.broadcast %218 : vector<16x1xf32> to vector<16x32xf32>
    %220 = arith.mulf %210, %219 : vector<16x32xf32>
    %221 = vector.broadcast %143 : vector<1x32xf32> to vector<16x32xf32>
    %222 = arith.mulf %220, %221 : vector<16x32xf32>
    %223 = vector.broadcast %145 : vector<1x32xf32> to vector<16x32xf32>
    %224 = arith.addf %222, %223 : vector<16x32xf32>
    %225 = arith.truncf %224 : vector<16x32xf32> to vector<16x32xbf16>
    %cst_109 = arith.constant dense<0.000000e+00> : vector<16x64xf32>
    %226 = tpu.matmul %225, %147, %cst_109 {dimension_numbers = #tpu.dot_dimension_numbers<[1], [0], [0], [1], [0, 0, 1, 1], [], []>} : vector<16x32xbf16>, vector<32x64xbf16>, vector<16x64xf32> -> vector<16x64xf32>
    %227 = vector.broadcast %149 : vector<1x64xf32> to vector<16x64xf32>
    %228 = arith.addf %226, %227 : vector<16x64xf32>
    %cst_110 = arith.constant 0.000000e+00 : f32
    %229 = vector.broadcast %cst_110 : f32 to vector<16x64xf32>
    %230 = arith.maximumf %228, %229 : vector<16x64xf32>
    %231 = arith.truncf %230 : vector<16x64xf32> to vector<16x64xbf16>
    %cst_111 = arith.constant dense<0.000000e+00> : vector<16x32xf32>
    %232 = tpu.matmul %231, %151, %cst_111 {dimension_numbers = #tpu.dot_dimension_numbers<[1], [0], [0], [1], [0, 0, 1, 1], [], []>} : vector<16x64xbf16>, vector<64x32xbf16>, vector<16x32xf32> -> vector<16x32xf32>
    %233 = vector.broadcast %153 : vector<1x32xf32> to vector<16x32xf32>
    %234 = arith.addf %232, %233 : vector<16x32xf32>
    %235 = arith.addf %224, %234 : vector<16x32xf32>
    %cst_112 = arith.constant dense<0.000000e+00> : vector<16xf32>
    %236 = vector.multi_reduction <add>, %235, %cst_112 [1] : vector<16x32xf32> to vector<16xf32>
    %237 = vector.shape_cast %236 : vector<16xf32> to vector<16x1xf32>
    %cst_113 = arith.constant 3.125000e-02 : f32
    %238 = vector.broadcast %cst_113 : f32 to vector<16x1xf32>
    %239 = arith.mulf %237, %238 : vector<16x1xf32>
    %240 = vector.broadcast %239 : vector<16x1xf32> to vector<16x32xf32>
    %241 = arith.subf %235, %240 : vector<16x32xf32>
    %242 = arith.mulf %241, %241 : vector<16x32xf32>
    %cst_114 = arith.constant dense<0.000000e+00> : vector<16xf32>
    %243 = vector.multi_reduction <add>, %242, %cst_114 [1] : vector<16x32xf32> to vector<16xf32>
    %244 = vector.shape_cast %243 : vector<16xf32> to vector<16x1xf32>
    %cst_115 = arith.constant 3.125000e-02 : f32
    %245 = vector.broadcast %cst_115 : f32 to vector<16x1xf32>
    %246 = arith.mulf %244, %245 : vector<16x1xf32>
    %cst_116 = arith.constant 9.99999974E-6 : f32
    %247 = vector.broadcast %cst_116 : f32 to vector<16x1xf32>
    %248 = arith.addf %246, %247 : vector<16x1xf32>
    %249 = math.rsqrt %248 : vector<16x1xf32>
    %250 = vector.broadcast %249 : vector<16x1xf32> to vector<16x32xf32>
    %251 = arith.mulf %241, %250 : vector<16x32xf32>
    %252 = vector.broadcast %155 : vector<1x32xf32> to vector<16x32xf32>
    %253 = arith.mulf %251, %252 : vector<16x32xf32>
    %254 = vector.broadcast %157 : vector<1x32xf32> to vector<16x32xf32>
    %255 = arith.addf %253, %254 : vector<16x32xf32>
    %c0_117 = arith.constant 0 : index
    %c0_118 = arith.constant 0 : index
    %256 = vector.load %arg4[%c0_117, %c0_118] : memref<16x16xf32, #tpu.memory_space<vmem>>, vector<16x16xf32>
    %cst_119 = arith.constant dense<0.000000e+00> : vector<16x32xf32>
    %257 = tpu.matmul %256, %255, %cst_119 {dimension_numbers = #tpu.dot_dimension_numbers<[1], [0], [0], [1], [0, 0, 1, 1], [], []>} : vector<16x16xf32>, vector<16x32xf32>, vector<16x32xf32> -> vector<16x32xf32>
    %c0_120 = arith.constant 0 : index
    %c0_121 = arith.constant 0 : index
    %258 = vector.load %arg17[%c0_120, %c0_121] : memref<16x32xf32, #tpu.memory_space<vmem>>, vector<16x32xf32>
    tpu.vector_store %arg17[%c0_120, %c0_121], %257 {strides = array<i32>} : memref<16x32xf32, #tpu.memory_space<vmem>>, vector<16x32xf32>,
    return
  }
}

</mosaic_0001>

<bundles_post_ra>
// kernel: clusterformer_forward.1
= control target key start
LH: loop header
LB: loop body
LE: loop exit
PB: predicated region body
PF: predicated region fallthrough
CT: control target
= control target key end

     0   :  { %s4526_s0 = inlined_call_operand.vmem [shape: s32[16,1], index: 0, kind: input, shape index: {}]   ;;  %s4527_s1 = inlined_call_operand.vmem [shape: f32[128,32], index: 1, kind: input, shape index: {}]   ;;  %s4528_s2 = inlined_call_operand.vmem [shape: f32[16,32], index: 2, kind: input, shape index: {}]   ;;  %s4529_s3 = inlined_call_operand.vmem [shape: f32[16,16], index: 3, kind: input, shape index: {}]   ;;  %s4530_s4 = inlined_call_operand.vmem [shape: f32[16,16], index: 4, kind: input, shape index: {}]   ;;  %s4531_s5 = inlined_call_operand.vmem [shape: bf16[2,32,96], index: 5, kind: input, shape index: {}]   ;;  %s4532_s6 = inlined_call_operand.vmem [shape: f32[2,1,96], index: 6, kind: input, shape index: {}]   ;;  %s4533_s7 = inlined_call_operand.vmem [shape: bf16[2,32,32], index: 7, kind: input, shape index: {}]   ;;  %s4534_s8 = inlined_call_operand.vmem [shape: f32[2,1,32], index: 8, kind: input, shape index: {}]   ;;  %s4535_s9 = inlined_call_operand.vmem [shape: f32[2,1,32], index: 9, kind: input, shape index: {}]   ;;  %s4536_s10 = inlined_call_operand.vmem [shape: f32[2,1,32], index: 10, kind: input, shape index: {}]   ;;  %s4537_s11 = inlined_call_operand.vmem [shape: bf16[2,32,64], index: 11, kind: input, shape index: {}]   ;;  %s4538_s12 = inlined_call_operand.vmem [shape: f32[2,1,64], index: 12, kind: input, shape index: {}]   ;;  %s4539_s13 = inlined_call_operand.vmem [shape: bf16[2,64,32], index: 13, kind: input, shape index: {}]   ;;  %s4540_s14 = inlined_call_operand.vmem [shape: f32[2,1,32], index: 14, kind: input, shape index: {}]   ;;  %s4541_s15 = inlined_call_operand.vmem [shape: f32[2,1,32], index: 15, kind: input, shape index: {}]   ;;  %s4542_s16 = inlined_call_operand.vmem [shape: f32[2,1,32], index: 16, kind: input, shape index: {}]   ;;  %s4543_s17 = inlined_call_operand.hbm [shape: f32[16,32], index: 17, kind: output, shape index: {}]  }
   0x1   :  { %4547 = sst [smem:[#allocation5_spill]] %s4526_s0 }
   0x2   :  { %4548 = sst [smem:[#allocation6_spill]] %s4527_s1 }
   0x3   :  { %4549 = sst [smem:[#allocation7_spill]] %s4530_s4 }
   0x4   :  { %s4550_s26 = sld [smem:[#allocation5_spill]]  ;;  %s4551_s4 = sld [smem:[#allocation6_spill]]  ;;  %v3775_v2 = vmov 0  }
   0x5   :  { %3590 = vset.pattern.permute.xlu0 %v3775_v2 }
   0xa   :  { %v58_v0 = vld [vmem:[%s4550_s26] sm:$0xff]  ;;  %v75_v3 = vld [vmem:[%s4551_s4 + $0x8] sm:$0xff]  ;;  %v76_v4 = vld [vmem:[%s4551_s4 + $0x10] sm:$0xff] }
   0xb   :  { %v74_v1 = vld [vmem:[%s4551_s4] sm:$0xff]  ;;  %v77_v5 = vld [vmem:[%s4551_s4 + $0x18] sm:$0xff]  ;;  %63 = vperm.xlu0 %3590, %v58_v0   ;;  %v59_v8 = vld [vmem:[%s4550_s26 + $0x8] sm:$0xff] }
   0xc   :  { %v3536_v6 = vpack.c.bf16 %v75_v3, %v74_v1  ;;  %v3540_v7 = vpack.c.bf16 %v77_v5, %v76_v4  ;;  %v78_v9 = vld [vmem:[%s4551_s4 + $0x20] sm:$0xff]  ;;  %v79_v10 = vld [vmem:[%s4551_s4 + $0x28] sm:$0xff]  ;;  %v80_v11 = vld [vmem:[%s4551_s4 + $0x30] sm:$0xff] }
   0xd   :  { %v81_v12 = vld [vmem:[%s4551_s4 + $0x38] sm:$0xff]  ;;  %v3544_v13 = vpack.c.bf16 %v79_v10, %v78_v9  ;;  %v82_v14 = vld [vmem:[%s4551_s4 + $0x40] sm:$0xff]  ;;  %v83_v15 = vld [vmem:[%s4551_s4 + $0x48] sm:$0xff] }
   0xe   :  { %3537 = vmatprep.subr.bf16.mxu0 %v3536_v6  ;;  %v3548_v16 = vpack.c.bf16 %v81_v12, %v80_v11  ;;  %v84_v17 = vld [vmem:[%s4551_s4 + $0x50] sm:$0xff]  ;;  %v85_v18 = vld [vmem:[%s4551_s4 + $0x58] sm:$0xff]  ;;  %v3552_v19 = vpack.c.bf16 %v83_v15, %v82_v14  ;;  %v86_v20 = vld [vmem:[%s4551_s4 + $0x60] sm:$0xff] }
   0xf   :  { %3539 = vmatpush3.bf16.msra.mxu0 %v3536_v6  ;;  %66 = vperm.xlu0 %3590, %v59_v8   ;;  %v3556_v21 = vpack.c.bf16 %v85_v18, %v84_v17  ;;  %v87_v22 = vld [vmem:[%s4551_s4 + $0x68] sm:$0xff] }
  0x10   :  { %3541 = vmatprep.subr.bf16.mxu0 %v3540_v7 }
  0x13   :  { %3543 = vmatpush3.bf16.msra.mxu0 %v3540_v7 }
  0x14   :  { %3545 = vmatprep.subr.bf16.mxu0 %v3544_v13 }
  0x17   :  { %3547 = vmatpush3.bf16.msra.mxu0 %v3544_v13 }
  0x18   :  { %3549 = vmatprep.subr.bf16.mxu0 %v3548_v16 }
  0x1b   :  { %3551 = vmatpush3.bf16.msra.mxu0 %v3548_v16 }
  0x1c   :  { %3553 = vmatprep.subr.bf16.mxu0 %v3552_v19 }
  0x1d   :  { %22 = vsyncpa [#allocation3], 0  ;;  %v3560_v23 = vpack.c.bf16 %v87_v22, %v86_v20  ;;  %v88_v24 = vld [vmem:[%s4551_s4 + $0x70] sm:$0xff]  ;;  %v89_v25 = vld [vmem:[%s4551_s4 + $0x78] sm:$0xff]  ;;  %v60_v27 = vlaneseq  ;;  %v3776_v30 = vmov 1.0   ;;  %vm169_vm2 = vcmask 130048  }
  0x1e   :  { %v3564_v26 = vpack.c.bf16 %v89_v25, %v88_v24  ;;  %v165_v32 = vld [vmem:[%s4529_s3] sm:$0xff]  ;;  %v3777_v33 = vmov 0.0   ;;  %v166_v37 = vld [vmem:[%s4529_s3 + $0x8] sm:$0xff]  ;;  %vm3778_vm3 = vmmov 0   ;;  %vm298_vm4 = vcmask 261120   ;;  %s3780_s29 = smov 120  }
  0x1f   :  { %3555 = vmatpush3.bf16.msra.mxu0 %v3552_v19  ;;  %v61_v28 = vand.u32 127, %v60_v27  ;;  %3262 = vmatprep.mubr.msk.f32.mxu1 %vm169_vm2, %v165_v32  ;;  %v3651_v38 = vld [vmem:[%s4531_s5] sm:$0xff]   ;;  %v3652_v39 = vld [vmem:[%s4531_s5 + $0x8] sm:$0xff]   ;;  %s3781_s0 = smov 112   ;;  %s3782_s26 = smov 96   ;;  %vm374_vm5 = vcmask 64512  }
  0x20   :  { %3557 = vmatprep.subr.bf16.mxu0 %v3556_v21  ;;  %v168_v40 = vld [vmem:[%s4528_s2 + $0x8] sm:$0xff]  ;;  %v167_v41 = vld [vmem:[%s4528_s2] sm:$0xff]  ;;  %s3779_s2 = smov 104   ;;  %s3783_s30 = smov 64   ;;  %vm865_vm6 = vcmask 1043456   ;;  %vm1273_vm7 = vcmask 195584  }
  0x21   :  { %v2999_v47 = vld [vmem:[%s4532_s6] ss:$0 sm:$0xff]  ;;  %s3784_s18 = smov 8   ;;  %s3785_s21 = smov 16   ;;  %vm1479_vm8 = vcmask 523264  }
  0x22   :  { %s3786_s22 = smov 24  }
  0x23   :  { %3559 = vmatpush3.bf16.msra.mxu0 %v3556_v21 }
  0x24   :  { %3561 = vmatprep.subr.bf16.mxu0 %v3560_v23 }
  0x27   :  { %3563 = vmatpush3.bf16.msra.mxu0 %v3560_v23 }
  0x28   :  { %3565 = vmatprep.subr.bf16.mxu0 %v3564_v26 }
  0x2b   :  { %3567 = vmatpush3.bf16.msra.mxu0 %v3564_v26 }
  0x2c   :  { %3291 = vmatprep.subr.bf16.mxu0 %v3777_v33 }
  0x8a   :  { %v64_v29 = vpop.permute.xlu0 %63 }
  0x8b   :  { %vm68_vm0 = vcmp.eq.s32.totalorder %v64_v29, %v61_v28 }
  0x8c   :  { %3255 = vmatprep.mubr.msk.f32.mxu0 %vm68_vm0, %v3776_v30 }
  0x8e   :  { %v67_v31 = vpop.permute.xlu0 %66 }
  0x8f   :  { %vm69_vm1 = vcmp.eq.s32.totalorder %v67_v31, %v61_v28 }
  0x90   :  { %3256 = vmatmul.mubr.msk.f32.vlgmr.msra.gmra.mrb[0].mxu0 %vm69_vm1, %v3776_v30 }
  0x91   :  { %3293 = vmatprep.mubr.msk.bf16.mxu0 %vm3778_vm3, %v3777_v33 }
 0x163   :  { %v3257_v34 = vpop.f32.mrb[0].mxu0 }
 0x164   :  { %v156_v35 = vpop.f32.mrb[1].mxu0 }
 0x165   :  { %v3568_v36 = vpack.c.bf16 %v3257_v34, %v156_v35 }
 0x167   :  { %3569 = vmatprep.subr.bf16.mxu1 %v3568_v36 }
 0x168   :  { %3571 = vmatpush3.bf16.msra.mxu1 %v3568_v36 }
 0x169   :  { %3265 = vmatprep.subr.bf16.mxu1 %v3777_v33 }
 0x16b   :  { %3263 = vmatmul.mubr.msk.f32.vlgmr.msra.gmra.mrb[0].mxu1 %vm169_vm2, %v166_v37 }
 0x16c   :  { %3266 = vmatpush3.bf16.msra.mxu1 %v3651_v38  ;;  %3269 = vmatprep.mubr.msk.bf16.mxu1 %vm3778_vm3, %v3777_v33 }
 0x16d   :  { %3267 = vmatprep.subr.bf16.mxu1 %v3777_v33 }
 0x170   :  { %3268 = vmatpush3.bf16.msra.mxu1 %v3652_v39 }
 0x171   :  { %3273 = vmatprep.subr.bf16.mxu1 %v3777_v33 }
 0x23e   :  { %v3264_v42 = vpop.f32.mrb[0].mxu1 }
 0x23f   :  { %v3961_v43 = vadd.f32 %v3264_v42, %v168_v40  ;;  %v242_v44 = vpop.f32.mrb[1].mxu1 }
 0x240   :  { %v3963_v45 = vadd.f32 %v242_v44, %v167_v41 }
 0x242   :  { %v279_v46 = vpack.c.bf16 %v3961_v43, %v3963_v45 }
 0x244   :  { %3270 = vmatmul.mubr.msk.bf16.vlgmr.msra.gmra.mrb[4].mxu1 %vm298_vm4, %v279_v46 }
 0x245   :  { %3275 = vmatprep.mubr.msk.bf16.mxu1 %vm3778_vm3, %v3777_v33 }
 0x317   :  { %v336_v48 = vpop.f32.mrb[4].mxu1 }
 0x318   :  { %v3271_v49 = vpop.f32.mrb[5].mxu1  ;;  %v337_v51 = vadd.f32 %v2999_v47, %v336_v48 }
 0x319   :  { %v339_v50 = vpop.f32.mrb[6].mxu1 }
 0x31a   :  { %v340_v52 = vadd.f32 %v2999_v47, %v339_v50  ;;  %v3272_v53 = vpop.f32.mrb[7].mxu1  ;;  %v363_v56 = vpack.c.bf16 %v337_v51, %v337_v51 }
 0x31c   :  { %v3601_v54 = vpack.i.bf16 %v340_v52, %v337_v51  ;;  %v364_v55 = vpack.c.bf16 %v340_v52, %v340_v52 }
 0x31e   :  { %3602 = vrot.lane.b32.xlu0 %v3601_v54, %s3779_s2  ;;  %3592 = vrot.lane.b32.xlu1 %v3601_v54, %s3780_s29 }
 0x322   :  { %3597 = vrot.lane.b32.xlu1 %v3601_v54, %s3781_s0  ;;  %422 = vrot.lane.b32.xlu0 %v364_v55, %s3782_s26 }
 0x326   :  { %372 = vrot.lane.b32.xlu1 %v363_v56, %s3782_s26 }
 0x390   :  { %v3593_v57 = vpop.permute.xlu1 %3592  ;;  %v3603_v62 = vpop.permute.xlu0 %3602 }
 0x391   :  { %v3595_v58 = vunpack.i.h.bf16 %v3593_v57  ;;  %v3594_v59 = vunpack.i.l.bf16 %v3593_v57  ;;  %v3605_v2 = vunpack.i.h.bf16 %v3603_v62  ;;  %v3604_v3 = vunpack.i.l.bf16 %v3603_v62 }
 0x393   :  { %v3978_v60 = vpack.c.bf16 %v3595_v58, %v3595_v58  ;;  %v3980_v61 = vpack.c.bf16 %v3594_v59, %v3594_v59  ;;  %v3995_v8 = vpack.c.bf16 %v3605_v2, %v3605_v2  ;;  %v3997_v9 = vpack.c.bf16 %v3604_v3, %v3604_v3 }
 0x394   :  { %v3598_v63 = vpop.permute.xlu1 %3597  ;;  %v423_v10 = vpop.permute.xlu0 %422 }
 0x395   :  { %v3600_v0 = vunpack.i.h.bf16 %v3598_v63  ;;  %v3599_v1 = vunpack.i.l.bf16 %v3598_v63  ;;  %471 = vrot.lane.b32.xlu1 %v3980_v61, %s3782_s26  ;;  %520 = vrot.lane.b32.xlu0 %v3978_v60, %s3782_s26  ;;  %v428_v11 = vsel %vm374_vm5, %v423_v10, 0 }
 0x397   :  { %v3986_v4 = vpack.c.bf16 %v3600_v0, %v3600_v0  ;;  %v3988_v5 = vpack.c.bf16 %v3599_v1, %v3599_v1 }
 0x398   :  { %v373_v6 = vpop.permute.xlu1 %372 }
 0x399   :  { %v379_v7 = vsel %vm374_vm5, %v373_v6, 0  ;;  %569 = vrot.lane.b32.xlu1 %v3988_v5, %s3782_s26  ;;  %618 = vrot.lane.b32.xlu0 %v3986_v4, %s3782_s26 }
 0x39a   :  { %3274 = vmatpush3.bf16.xpose.msra.mxu1 %v379_v7 }
 0x39b   :  { %3279 = vmatprep.subr.bf16.mxu1 %v3777_v33 }
 0x39d   :  { %667 = vrot.lane.b32.xlu1 %v3997_v9, %s3782_s26  ;;  %716 = vrot.lane.b32.xlu0 %v3995_v8, %s3782_s26 }
 0x3a1   :  { %3276 = vmatmul.mubr.msk.bf16.vlgmr.msra.gmra.mrb[8].mxu1 %vm374_vm5, %v363_v56  ;;  %909 = vrot.lane.b32.xlu1 %v364_v55, %s3783_s30 }
 0x3a2   :  { %860 = vrot.lane.b32.xlu0 %v363_v56, %s3783_s30  ;;  %3280 = vmatpush3.bf16.xpose.msra.mxu1 %v428_v11 }
 0x3a3   :  { %3281 = vmatprep.mubr.msk.bf16.mxu1 %vm3778_vm3, %v3777_v33  ;;  %3285 = vmatprep.subr.bf16.mxu1 %v3777_v33 }
 0x3a9   :  { %3282 = vmatmul.mubr.msk.bf16.vlgmr.msra.gmra.mrb[12].mxu1 %vm374_vm5, %v364_v55 }
 0x3aa   :  { %3287 = vmatprep.mubr.msk.bf16.mxu1 %vm3778_vm3, %v3777_v33 }
 0x407   :  { %v472_v12 = vpop.permute.xlu1 %471  ;;  %v521_v13 = vpop.permute.xlu0 %520 }
 0x408   :  { %v477_v14 = vsel %vm374_vm5, %v472_v12, 0  ;;  %v526_v15 = vsel %vm374_vm5, %v521_v13, 0 }
 0x409   :  { %3286 = vmatpush3.bf16.xpose.msra.mxu1 %v477_v14  ;;  %3292 = vmatpush3.bf16.xpose.msra.mxu0 %v526_v15 }
 0x40a   :  { %3297 = vmatprep.subr.bf16.mxu1 %v3777_v33  ;;  %3303 = vmatprep.subr.bf16.mxu0 %v3777_v33 }
 0x40b   :  { %v570_v16 = vpop.permute.xlu1 %569  ;;  %v619_v17 = vpop.permute.xlu0 %618 }
 0x40c   :  { %v575_v18 = vsel %vm374_vm5, %v570_v16, 0  ;;  %v624_v19 = vsel %vm374_vm5, %v619_v17, 0 }
 0x40f   :  { %v668_v20 = vpop.permute.xlu1 %667  ;;  %v717_v21 = vpop.permute.xlu0 %716 }
 0x410   :  { %3288 = vmatmul.mubr.msk.bf16.vlgmr.msra.gmra.mrb[16].mxu1 %vm374_vm5, %v3980_v61  ;;  %3294 = vmatmul.mubr.msk.bf16.vlgmr.msra.gmra.mrb[4].mxu0 %vm374_vm5, %v3978_v60  ;;  %v673_v22 = vsel %vm374_vm5, %v668_v20, 0  ;;  %v722_v23 = vsel %vm374_vm5, %v717_v21, 0 }
 0x411   :  { %3298 = vmatpush3.bf16.xpose.msra.mxu1 %v575_v18  ;;  %3304 = vmatpush3.bf16.xpose.msra.mxu0 %v624_v19 }
 0x412   :  { %3299 = vmatprep.mubr.msk.bf16.mxu1 %vm3778_vm3, %v3777_v33  ;;  %3305 = vmatprep.mubr.msk.bf16.mxu0 %vm3778_vm3, %v3777_v33 }
 0x413   :  { %3309 = vmatprep.subr.bf16.mxu1 %v3777_v33  ;;  %3315 = vmatprep.subr.bf16.mxu0 %v3777_v33  ;;  %v910_v24 = vpop.permute.xlu1 %909 }
 0x414   :  { %v861_v25 = vpop.permute.xlu0 %860  ;;  %v915_v26 = vsel %vm865_vm6, %v910_v24, 0 }
 0x415   :  { %v867_v27 = vsel %vm865_vm6, %v861_v25, 0 }
 0x418   :  { %3300 = vmatmul.mubr.msk.bf16.vlgmr.msra.gmra.mrb[20].mxu1 %vm374_vm5, %v3988_v5  ;;  %3306 = vmatmul.mubr.msk.bf16.vlgmr.msra.gmra.mrb[8].mxu0 %vm374_vm5, %v3986_v4 }
 0x419   :  { %3310 = vmatpush3.bf16.xpose.msra.mxu1 %v673_v22  ;;  %3316 = vmatpush3.bf16.xpose.msra.mxu0 %v722_v23 }
 0x41a   :  { %3311 = vmatprep.mubr.msk.bf16.mxu1 %vm3778_vm3, %v3777_v33  ;;  %3317 = vmatprep.mubr.msk.bf16.mxu0 %vm3778_vm3, %v3777_v33 }
 0x41b   :  { %3321 = vmatprep.subr.bf16.mxu1 %v3777_v33  ;;  %3327 = vmatprep.subr.bf16.mxu0 %v3777_v33 }
 0x420   :  { %3312 = vmatmul.mubr.msk.bf16.vlgmr.msra.gmra.mrb[24].mxu1 %vm374_vm5, %v3997_v9  ;;  %3318 = vmatmul.mubr.msk.bf16.vlgmr.msra.gmra.mrb[12].mxu0 %vm374_vm5, %v3995_v8 }
 0x421   :  { %3322 = vmatpush3.bf16.msra.mxu1 %v867_v27  ;;  %3328 = vmatpush3.bf16.msra.mxu0 %v915_v26 }
 0x422   :  { %3323 = vmatprep.mubr.msk.bf16.mxu1 %vm3778_vm3, %v3777_v33  ;;  %3329 = vmatprep.mubr.msk.bf16.mxu0 %vm3778_vm3, %v3777_v33 }
 0x423   :  { %3333 = vmatprep.subr.bf16.mxu1 %v3777_v33  ;;  %3339 = vmatprep.subr.bf16.mxu0 %v3777_v33 }
 0x474   :  { %v415_v28 = vpop.f32.mrb[8].mxu1 }
 0x475   :  { %v3277_v29 = vpop.f32.mrb[9].mxu1  ;;  %v764_v30 = vsel %vm374_vm5, %v415_v28, -inf }
 0x476   :  { %765 = vmax.xlane.f32.xlu1 %v764_v30  ;;  %v418_v31 = vpop.f32.mrb[10].mxu1 }
 0x477   :  { %v3278_v32 = vpop.f32.mrb[11].mxu1 }
 0x47c   :  { %v464_v34 = vpop.f32.mrb[12].mxu1 }
 0x47d   :  { %v3283_v35 = vpop.f32.mrb[13].mxu1  ;;  %v767_v36 = vsel %vm374_vm5, %v464_v34, -inf }
 0x47e   :  { %768 = vmax.xlane.f32.xlu0 %v767_v36  ;;  %v467_v37 = vpop.f32.mrb[14].mxu1 }
 0x47f   :  { %v3284_v38 = vpop.f32.mrb[15].mxu1 }
 0x4e3   :  { %v513_v39 = vpop.f32.mrb[16].mxu1  ;;  %v562_v40 = vpop.f32.mrb[4].mxu0 }
 0x4e4   :  { %v3289_v41 = vpop.f32.mrb[17].mxu1  ;;  %v3295_v42 = vpop.f32.mrb[5].mxu0  ;;  %v773_v44 = vsel %vm374_vm5, %v562_v40, -inf  ;;  %v770_v46 = vsel %vm374_vm5, %v513_v39, -inf }
 0x4e5   :  { %v565_v47 = vpop.f32.mrb[6].mxu0  ;;  %774 = vmax.xlane.f32.xlu1 %v773_v44  ;;  %771 = vmax.xlane.f32.xlu0 %v770_v46  ;;  %v516_v48 = vpop.f32.mrb[18].mxu1 }
 0x4e6   :  { %v3290_v49 = vpop.f32.mrb[19].mxu1  ;;  %v3296_v50 = vpop.f32.mrb[7].mxu0 }
 0x4eb   :  { %v4058_v51 = vpop.f32.mrb[20].mxu1  ;;  %v660_v52 = vpop.f32.mrb[8].mxu0 }
 0x4ec   :  { %v3301_v53 = vpop.f32.mrb[21].mxu1  ;;  %v3307_v54 = vpop.f32.mrb[9].mxu0  ;;  %v779_v55 = vsel %vm374_vm5, %v660_v52, -inf  ;;  %v776_v56 = vsel %vm374_vm5, %v4058_v51, -inf }
 0x4ed   :  { %v663_v57 = vpop.f32.mrb[10].mxu0  ;;  %780 = vmax.xlane.f32.xlu1 %v779_v55  ;;  %777 = vmax.xlane.f32.xlu0 %v776_v56  ;;  %v614_v58 = vpop.f32.mrb[22].mxu1 }
 0x4ee   :  { %v3302_v59 = vpop.f32.mrb[23].mxu1  ;;  %v3308_v62 = vpop.f32.mrb[11].mxu0 }
 0x4f3   :  { %v4063_v63 = vpop.f32.mrb[24].mxu1  ;;  %v758_v0 = vpop.f32.mrb[12].mxu0 }
 0x4f4   :  { %v3313_v1 = vpop.f32.mrb[25].mxu1  ;;  %v3319_v2 = vpop.f32.mrb[13].mxu0  ;;  %v785_v3 = vsel %vm374_vm5, %v758_v0, -inf  ;;  %v782_v6 = vsel %vm374_vm5, %v4063_v63, -inf }
 0x4f5   :  { %v761_v7 = vpop.f32.mrb[14].mxu0  ;;  %786 = vmax.xlane.f32.xlu1 %v785_v3  ;;  %783 = vmax.xlane.f32.xlu0 %v782_v6  ;;  %v712_v10 = vpop.f32.mrb[26].mxu1 }
 0x4f6   :  { %v3314_v11 = vpop.f32.mrb[27].mxu1  ;;  %v3320_v12 = vpop.f32.mrb[15].mxu0 }
 0x503   :  { %v766_v13 = vpop.xlane.xlu1 %765 }
 0x504   :  { %v788_v15 = vsub.f32 %v415_v28, %v766_v13 }
 0x506   :  { %957 = vrot.lane.b32.xlu1 %v3980_v61, %s3783_s30  ;;  %v796_v17 = vmul.f32 1.442695, %v788_v15 }
 0x508   :  { %3671 = vpow2.f32 %v796_v17 }
 0x50b   :  { %1005 = vrot.lane.b32.xlu0 %v3978_v60, %s3783_s30  ;;  %v769_v14 = vpop.xlane.xlu0 %768 }
 0x50c   :  { %v789_v16 = vsub.f32 %v464_v34, %v769_v14 }
 0x50e   :  { %v798_v18 = vmul.f32 1.442695, %v789_v16 }
 0x510   :  { %3673 = vpow2.f32 %v798_v18 }
 0x512   :  { %v3672_v19 = vpop.eup %3671 }
 0x513   :  { %v812_v22 = vsel %vm374_vm5, %v3672_v19, 0.0 }
 0x51a   :  { %v3674_v20 = vpop.eup %3673 }
 0x51b   :  { %v815_v21 = vsel %vm374_vm5, %v3674_v20, 0.0 }
 0x52a   :  { %816 = vadd.xlane.f32.xlu1 %v815_v21  ;;  %813 = vadd.xlane.f32.xlu0 %v812_v22 }
 0x53b   :  { %1053 = vrot.lane.b32.xlu1 %v3988_v5, %s3783_s30 }
 0x572   :  { %v775_v60 = vpop.xlane.xlu1 %774  ;;  %v772_v61 = vpop.xlane.xlu0 %771 }
 0x573   :  { %v791_v23 = vsub.f32 %v562_v40, %v775_v60  ;;  %v790_v24 = vsub.f32 %v513_v39, %v772_v61 }
 0x575   :  { %v802_v25 = vmul.f32 1.442695, %v791_v23  ;;  %v800_v26 = vmul.f32 1.442695, %v790_v24 }
 0x577   :  { %3675 = vpow2.f32 %v802_v25 }
 0x578   :  { %3677 = vpow2.f32 %v800_v26 }
 0x57a   :  { %v781_v27 = vpop.xlane.xlu1 %780  ;;  %v778_v41 = vpop.xlane.xlu0 %777 }
 0x57b   :  { %v793_v28 = vsub.f32 %v660_v52, %v781_v27  ;;  %v792_v42 = vsub.f32 %v4058_v51, %v778_v41 }
 0x57d   :  { %v806_v29 = vmul.f32 1.442695, %v793_v28  ;;  %v804_v46 = vmul.f32 1.442695, %v792_v42 }
 0x57f   :  { %3679 = vpow2.f32 %v806_v29 }
 0x581   :  { %v4076_v30 = vpop.eup %3675 }
 0x582   :  { %v4078_v31 = vpop.eup %3677  ;;  %v787_v32 = vpop.xlane.xlu1 %786  ;;  %v821_v5 = vsel %vm374_vm5, %v4076_v30, 0.0 }
 0x583   :  { %v795_v34 = vsub.f32 %v758_v0, %v787_v32  ;;  %822 = vadd.xlane.f32.xlu1 %v821_v5  ;;  %v818_v35 = vsel %vm374_vm5, %v4078_v31, 0.0  ;;  %v784_v44 = vpop.xlane.xlu0 %783 }
 0x584   :  { %819 = vadd.xlane.f32.xlu0 %v818_v35  ;;  %v794_v47 = vsub.f32 %v4063_v63, %v784_v44 }
 0x585   :  { %v810_v36 = vmul.f32 1.442695, %v795_v34 }
 0x586   :  { %v808_v48 = vmul.f32 1.442695, %v794_v47  ;;  %v958_v49 = vpop.permute.xlu1 %957 }
 0x587   :  { %3681 = vpow2.f32 %v810_v36  ;;  %v1006_v50 = vpop.permute.xlu0 %1005  ;;  %v963_v0 = vsel %vm865_vm6, %v958_v49, 0 }
 0x588   :  { %3683 = vpow2.f32 %v804_v46  ;;  %v1011_v63 = vsel %vm865_vm6, %v1006_v50, 0 }
 0x589   :  { %v4084_v37 = vpop.eup %3679  ;;  %3685 = vpow2.f32 %v808_v48 }
 0x58a   :  { %v827_v38 = vsel %vm374_vm5, %v4084_v37, 0.0 }
 0x58b   :  { %828 = vadd.xlane.f32.xlu1 %v827_v38 }
 0x591   :  { %v4088_v39 = vpop.eup %3681 }
 0x592   :  { %v833_v40 = vsel %vm374_vm5, %v4088_v39, 0.0  ;;  %v4098_v52 = vpop.eup %3683 }
 0x593   :  { %834 = vadd.xlane.f32.xlu1 %v833_v40  ;;  %v4102_v51 = vpop.eup %3685 }
 0x59a   :  { %1101 = vrot.lane.b32.xlu0 %v3986_v4, %s3783_s30  ;;  %v824_v4 = vsel %vm374_vm5, %v4098_v52, 0.0 }
 0x5a4   :  { %1149 = vrot.lane.b32.xlu1 %v3997_v9, %s3783_s30  ;;  %v830_v9 = vsel %vm374_vm5, %v4102_v51, 0.0 }
 0x5b7   :  { %v817_v53 = vpop.xlane.xlu1 %816  ;;  %v814_v54 = vpop.xlane.xlu0 %813 }
 0x5b8   :  { %3687 = vrcp.f32 %v817_v53 }
 0x5b9   :  { %3689 = vrcp.f32 %v814_v54  ;;  %825 = vadd.xlane.f32.xlu0 %v824_v4 }
 0x5bb   :  { %v1054_v1 = vpop.permute.xlu1 %1053 }
 0x5bd   :  { %831 = vadd.xlane.f32.xlu0 %v830_v9 }
 0x5c2   :  { %v3688_v55 = vpop.eup %3687 }
 0x5c3   :  { %v3690_v56 = vpop.eup %3689  ;;  %v845_v57 = vmul.f32 %v3688_v55, %v3674_v20  ;;  %v3653_v55 = vld [vmem:[%s4533_s7] sm:$0xff]  }
 0x5c4   :  { %v844_v58 = vmul.f32 %v3690_v56, %v3672_v19 }
 0x5c5   :  { %v853_v59 = vpack.c.bf16 %v845_v57, %v845_v57 }
 0x5c6   :  { %v852_v62 = vpack.c.bf16 %v844_v58, %v844_v58 }
 0x5c7   :  { %3330 = vmatmul.mubr.msk.bf16.vlgmr.msra.gmra.mrb[16].mxu0 %vm374_vm5, %v853_v59  ;;  %v3654_v59 = vld [vmem:[%s4533_s7 + $0x8] sm:$0xff]  }
 0x5c8   :  { %3324 = vmatmul.mubr.msk.bf16.vlgmr.msra.gmra.mrb[28].mxu1 %vm374_vm5, %v852_v62  ;;  %3340 = vmatpush3.bf16.msra.mxu0 %v1011_v63 }
 0x5c9   :  { %3334 = vmatpush3.bf16.msra.mxu1 %v963_v0  ;;  %3335 = vmatprep.mubr.msk.bf16.mxu1 %vm3778_vm3, %v3777_v33 }
 0x5ca   :  { %3341 = vmatprep.mubr.msk.bf16.mxu0 %vm3778_vm3, %v3777_v33  ;;  %3345 = vmatprep.subr.bf16.mxu1 %v3777_v33 }
 0x5cb   :  { %3351 = vmatprep.subr.bf16.mxu0 %v3777_v33 }
 0x5d3   :  { %1197 = vrot.lane.b32.xlu0 %v3995_v8, %s3783_s30  ;;  %v1059_v8 = vsel %vm865_vm6, %v1054_v1, 0 }
 0x610   :  { %v823_v2 = vpop.xlane.xlu1 %822 }
 0x611   :  { %3691 = vrcp.f32 %v823_v2  ;;  %v820_v3 = vpop.xlane.xlu0 %819 }
 0x612   :  { %3693 = vrcp.f32 %v820_v3 }
 0x615   :  { %v1102_v13 = vpop.permute.xlu0 %1101 }
 0x616   :  { %v1107_v16 = vsel %vm865_vm6, %v1102_v13, 0 }
 0x618   :  { %v829_v6 = vpop.xlane.xlu1 %828 }
 0x619   :  { %3695 = vrcp.f32 %v829_v6 }
 0x61b   :  { %v3692_v7 = vpop.eup %3691 }
 0x61c   :  { %v3694_v10 = vpop.eup %3693  ;;  %v847_v11 = vmul.f32 %v3692_v7, %v4076_v30 }
 0x61d   :  { %v846_v12 = vmul.f32 %v3694_v10, %v4078_v31 }
 0x61e   :  { %v855_v14 = vpack.c.bf16 %v847_v11, %v847_v11 }
 0x61f   :  { %v854_v15 = vpack.c.bf16 %v846_v12, %v846_v12 }
 0x620   :  { %3342 = vmatmul.mubr.msk.bf16.vlgmr.msra.gmra.mrb[20].mxu0 %vm374_vm5, %v855_v14  ;;  %v835_v20 = vpop.xlane.xlu1 %834 }
 0x621   :  { %3336 = vmatmul.mubr.msk.bf16.vlgmr.msra.gmra.mrb[32].mxu1 %vm374_vm5, %v854_v15  ;;  %3352 = vmatpush3.bf16.msra.mxu0 %v1107_v16  ;;  %3697 = vrcp.f32 %v835_v20 }
 0x622   :  { %3346 = vmatpush3.bf16.msra.mxu1 %v1059_v8  ;;  %3353 = vmatprep.mubr.msk.bf16.mxu0 %vm3778_vm3, %v3777_v33 }
 0x623   :  { %v3696_v17 = vpop.eup %3695  ;;  %3363 = vmatprep.subr.bf16.mxu0 %v3777_v33  ;;  %3347 = vmatprep.mubr.msk.bf16.mxu1 %vm3778_vm3, %v3777_v33 }
 0x624   :  { %v849_v18 = vmul.f32 %v3696_v17, %v4084_v37  ;;  %3357 = vmatprep.subr.bf16.mxu1 %v3777_v33  ;;  %v1150_v28 = vpop.permute.xlu1 %1149 }
 0x625   :  { %v1155_v31 = vsel %vm865_vm6, %v1150_v28, 0 }
 0x626   :  { %v857_v19 = vpack.c.bf16 %v849_v18, %v849_v18 }
 0x628   :  { %3354 = vmatmul.mubr.msk.bf16.vlgmr.msra.gmra.mrb[24].mxu0 %vm374_vm5, %v857_v19 }
 0x629   :  { %3365 = vmatprep.mubr.msk.bf16.mxu0 %vm3778_vm3, %v3777_v33 }
 0x62b   :  { %v3698_v22 = vpop.eup %3697 }
 0x62c   :  { %v851_v61 = vmul.f32 %v3698_v22, %v4088_v39 }
 0x62e   :  { %v859_v26 = vpack.c.bf16 %v851_v61, %v851_v61 }
 0x646   :  { %v826_v21 = vpop.xlane.xlu0 %825 }
 0x647   :  { %3699 = vrcp.f32 %v826_v21 }
 0x64a   :  { %v832_v60 = vpop.xlane.xlu0 %831 }
 0x64b   :  { %3701 = vrcp.f32 %v832_v60 }
 0x64e   :  { %v1198_v23 = vpop.permute.xlu0 %1197 }
 0x64f   :  { %v1203_v24 = vsel %vm865_vm6, %v1198_v23, 0 }
 0x650   :  { %3364 = vmatpush3.bf16.msra.mxu0 %v1203_v24 }
 0x651   :  { %v3700_v25 = vpop.eup %3699  ;;  %3377 = vmatprep.subr.bf16.mxu0 %v3777_v33 }
 0x652   :  { %v848_v27 = vmul.f32 %v3700_v25, %v4098_v52 }
 0x653   :  { %3366 = vmatmul.mubr.msk.bf16.vlgmr.msra.gmra.mrb[28].mxu0 %vm374_vm5, %v859_v26  ;;  %v3019_v26 = vld [vmem:[%s4534_s8] ss:$0 sm:$0xff] }
 0x654   :  { %v856_v29 = vpack.c.bf16 %v848_v27, %v848_v27  ;;  %3381 = vmatprep.mubr.msk.bf16.mxu0 %vm3778_vm3, %v3777_v33 }
 0x655   :  { %v3702_v30 = vpop.eup %3701 }
 0x656   :  { %3348 = vmatmul.mubr.msk.bf16.vlgmr.msra.gmra.mrb[36].mxu1 %vm374_vm5, %v856_v29  ;;  %v850_v32 = vmul.f32 %v3702_v30, %v4102_v51 }
 0x657   :  { %3358 = vmatpush3.bf16.msra.mxu1 %v1155_v31  ;;  %3359 = vmatprep.mubr.msk.bf16.mxu1 %vm3778_vm3, %v3777_v33 }
 0x658   :  { %3369 = vmatprep.subr.bf16.mxu1 %v3777_v33  ;;  %v858_v5 = vpack.c.bf16 %v850_v32, %v850_v32 }
 0x65e   :  { %3360 = vmatmul.mubr.msk.bf16.vlgmr.msra.gmra.mrb[40].mxu1 %vm374_vm5, %v858_v5 }
 0x65f   :  { %3373 = vmatprep.mubr.msk.bf16.mxu1 %vm3778_vm3, %v3777_v33  ;;  %3370 = vmatpush3.bf16.msra.mxu1 %v3653_v55 }
 0x660   :  { %3371 = vmatprep.subr.bf16.mxu1 %v3777_v33 }
 0x663   :  { %3372 = vmatpush3.bf16.msra.mxu1 %v3654_v59 }
 0x664   :  { %3385 = vmatprep.subr.bf16.mxu1 %v3777_v33 }
 0x69a   :  { %v951_v34 = vpop.f32.mrb[16].mxu0 }
 0x69b   :  { %v903_v35 = vpop.f32.mrb[28].mxu1  ;;  %v3331_v36 = vpop.f32.mrb[17].mxu0 }
 0x69c   :  { %v3325_v37 = vpop.f32.mrb[29].mxu1  ;;  %v954_v38 = vpop.f32.mrb[18].mxu0 }
 0x69d   :  { %v906_v39 = vpop.f32.mrb[30].mxu1  ;;  %v3332_v40 = vpop.f32.mrb[19].mxu0 }
 0x69e   :  { %v3326_v41 = vpop.f32.mrb[31].mxu1 }
 0x6f3   :  { %v1047_v42 = vpop.f32.mrb[20].mxu0 }
 0x6f4   :  { %v999_v44 = vpop.f32.mrb[32].mxu1  ;;  %v3343_v46 = vpop.f32.mrb[21].mxu0 }
 0x6f5   :  { %v3606_v47 = vpack.i.bf16 %v1047_v42, %v999_v44  ;;  %v3337_v48 = vpop.f32.mrb[33].mxu1  ;;  %v1050_v49 = vpop.f32.mrb[22].mxu0 }
 0x6f6   :  { %v1002_v50 = vpop.f32.mrb[34].mxu1  ;;  %v3344_v52 = vpop.f32.mrb[23].mxu0  ;;  %v3656_v48 = vld [vmem:[%s4537_s11 + $0x8] sm:$0xff]   ;;  %v3657_v49 = vld [vmem:[%s4539_s13] sm:$0xff]  }
 0x6f7   :  { %3607 = vrot.lane.b32.xlu1 %v3606_v47, %s3784_s18  ;;  %v3338_v53 = vpop.f32.mrb[35].mxu1  ;;  %v3658_v50 = vld [vmem:[%s4539_s13 + $0x8] sm:$0xff]  }
 0x6fb   :  { %v1143_v54 = vpop.f32.mrb[24].mxu0 }
 0x6fc   :  { %v3355_v4 = vpop.f32.mrb[25].mxu0 }
 0x6fd   :  { %v1146_v51 = vpop.f32.mrb[26].mxu0 }
 0x6fe   :  { %v3356_v9 = vpop.f32.mrb[27].mxu0 }
 0x726   :  { %v1239_v56 = vpop.f32.mrb[28].mxu0 }
 0x727   :  { %v3367_v57 = vpop.f32.mrb[29].mxu0 }
 0x728   :  { %v1242_v58 = vpop.f32.mrb[30].mxu0  ;;  %v3023_v57 = vld [vmem:[%s4535_s9] ss:$0 sm:$0xff] }
 0x729   :  { %v1095_v62 = vpop.f32.mrb[36].mxu1  ;;  %v3368_v63 = vpop.f32.mrb[31].mxu0 }
 0x72a   :  { %v3611_v0 = vpack.i.bf16 %v1143_v54, %v1095_v62  ;;  %v3349_v1 = vpop.f32.mrb[37].mxu1  ;;  %v3024_v63 = vld [vmem:[%s4536_s10] ss:$0 sm:$0xff] }
 0x72b   :  { %v1098_v2 = vpop.f32.mrb[38].mxu1 }
 0x72c   :  { %3612 = vrot.lane.b32.xlu0 %v3611_v0, %s3785_s21  ;;  %v3350_v3 = vpop.f32.mrb[39].mxu1 }
 0x731   :  { %v1191_v6 = vpop.f32.mrb[40].mxu1 }
 0x732   :  { %v3616_v7 = vpack.i.bf16 %v1239_v56, %v1191_v6  ;;  %v3361_v10 = vpop.f32.mrb[41].mxu1  ;;  %v3659_v6 = vld [vmem:[%s4539_s13 + $0x10] sm:$0xff]  }
 0x733   :  { %v1194_v11 = vpop.f32.mrb[42].mxu1  ;;  %v3025_v10 = vld [vmem:[%s4538_s12] ss:$0 sm:$0xff] }
 0x734   :  { %3617 = vrot.lane.b32.xlu1 %v3616_v7, %s3786_s22  ;;  %v3362_v12 = vpop.f32.mrb[43].mxu1  ;;  %v3660_v7 = vld [vmem:[%s4539_s13 + $0x18] sm:$0xff]  }
 0x769   :  { %v3608_v13 = vpop.permute.xlu1 %3607 }
 0x76a   :  { %v3610_v15 = vunpack.i.h.bf16 %v3608_v13  ;;  %v3609_v16 = vunpack.i.l.bf16 %v3608_v13 }
 0x76c   :  { %v1270_v19 = vsel %vm374_vm5, %v951_v34, %v3610_v15  ;;  %v1269_v20 = vsel %vm374_vm5, %v903_v35, %v3609_v16 }
 0x79e   :  { %v3613_v14 = vpop.permute.xlu0 %3612 }
 0x79f   :  { %v3615_v8 = vunpack.i.h.bf16 %v3613_v14  ;;  %v3614_v17 = vunpack.i.l.bf16 %v3613_v14 }
 0x7a1   :  { %v1272_v60 = vsel %vm169_vm2, %v1270_v19, %v3615_v8  ;;  %v1271_v61 = vsel %vm169_vm2, %v1269_v20, %v3614_v17  ;;  %v3029_v19 = vld [vmem:[%s4540_s14] ss:$0 sm:$0xff] }
 0x7a6   :  { %v3618_v18 = vpop.permute.xlu1 %3617 }
 0x7a7   :  { %v3620_v21 = vunpack.i.h.bf16 %v3618_v18  ;;  %v3619_v22 = vunpack.i.l.bf16 %v3618_v18 }
 0x7a9   :  { %v1275_v23 = vsel %vm1273_vm7, %v1272_v60, %v3620_v21  ;;  %v1274_v24 = vsel %vm1273_vm7, %v1271_v61, %v3619_v22 }
 0x7aa   :  { %v1276_v25 = vpack.c.bf16 %v1275_v23, %v1274_v24 }
 0x7ac   :  { %3374 = vmatmul.mubr.msk.bf16.vlgmr.msra.gmra.mrb[44].mxu1 %vm298_vm4, %v1276_v25 }
 0x7ad   :  { %3393 = vmatprep.mubr.msk.bf16.mxu1 %vm3778_vm3, %v3777_v33  ;;  %3386 = vmatpush3.bf16.msra.mxu1 %v3657_v49 }
 0x7ae   :  { %3387 = vmatprep.subr.bf16.mxu1 %v3777_v33 }
 0x7b1   :  { %3388 = vmatpush3.bf16.msra.mxu1 %v3658_v50 }
 0x7b2   :  { %3389 = vmatprep.subr.bf16.mxu1 %v3777_v33 }
 0x7b5   :  { %3390 = vmatpush3.bf16.msra.mxu1 %v3659_v6 }
 0x7b6   :  { %3391 = vmatprep.subr.bf16.mxu1 %v3777_v33 }
 0x7b9   :  { %3392 = vmatpush3.bf16.msra.mxu1 %v3660_v7 }
 0x7ba   :  { %3411 = vmatprep.subr.bf16.mxu1 %v3777_v33 }
 0x87f   :  { %v1332_v27 = vpop.f32.mrb[44].mxu1 }
 0x880   :  { %v1333_v28 = vadd.f32 %v3019_v26, %v1332_v27  ;;  %v3375_v29 = vpop.f32.mrb[45].mxu1 }
 0x881   :  { %v1335_v30 = vpop.f32.mrb[46].mxu1 }
 0x882   :  { %v1336_v31 = vadd.f32 %v3019_v26, %v1335_v30  ;;  %v3376_v32 = vpop.f32.mrb[47].mxu1  ;;  %v1339_v5 = vadd.f32 %v1333_v28, %v3963_v45 }
 0x884   :  { %v1341_v34 = vsel %vm298_vm4, %v1339_v5, 0.0  ;;  %v1340_v35 = vadd.f32 %v1336_v31, %v3961_v43  ;;  %v3655_v43 = vld [vmem:[%s4537_s11] sm:$0xff]  }
 0x885   :  { %1342 = vadd.xlane.f32.xlu0 %v1341_v34  ;;  %3378 = vmatpush3.bf16.msra.mxu0 %v3655_v43  ;;  %v3035_v43 = vld [vmem:[%s4541_s15] ss:$0 sm:$0xff] }
 0x886   :  { %v1344_v36 = vsel %vm298_vm4, %v1340_v35, 0.0  ;;  %3379 = vmatprep.subr.bf16.mxu0 %v3777_v33 }
 0x887   :  { %1345 = vadd.xlane.f32.xlu1 %v1344_v36 }
 0x889   :  { %3380 = vmatpush3.bf16.msra.mxu0 %v3656_v48 }
 0x88a   :  { %3397 = vmatprep.subr.bf16.mxu0 %v3777_v33 }
 0x912   :  { %v1343_v37 = vpop.xlane.xlu0 %1342 }
 0x913   :  { %v1347_v38 = vmul.f32 0.03125, %v1343_v37 }
 0x914   :  { %v1346_v39 = vpop.xlane.xlu1 %1345 }
 0x915   :  { %v1349_v40 = vsub.f32 %v1339_v5, %v1347_v38  ;;  %v1348_v41 = vmul.f32 0.03125, %v1346_v39  ;;  %v3661_v38 = vld [vmem:[%s4531_s5 + $0x10] sm:$0xff]   ;;  %v3662_v39 = vld [vmem:[%s4531_s5 + $0x18] sm:$0xff]  }
 0x917   :  { %v1350_v42 = vsub.f32 %v1340_v35, %v1348_v41  ;;  %v1351_v44 = vmul.f32 %v1349_v40, %v1349_v40 }
 0x919   :  { %v1353_v46 = vsel %vm298_vm4, %v1351_v44, 0.0  ;;  %v1352_v47 = vmul.f32 %v1350_v42, %v1350_v42 }
 0x91a   :  { %1354 = vadd.xlane.f32.xlu0 %v1353_v46 }
 0x91b   :  { %v1356_v45 = vsel %vm298_vm4, %v1352_v47, 0.0 }
 0x91e   :  { %1357 = vadd.xlane.f32.xlu0 %v1356_v45 }
 0x9a7   :  { %v1355_v52 = vpop.xlane.xlu0 %1354 }
 0x9a8   :  { %v1359_v53 = vmul.f32 0.03125, %v1355_v52 }
 0x9aa   :  { %v1361_v54 = vadd.f32 1e-05, %v1359_v53  ;;  %v3036_v53 = vld [vmem:[%s4542_s16] ss:$0 sm:$0xff] }
 0x9ab   :  { %v1358_v4 = vpop.xlane.xlu0 %1357 }
 0x9ac   :  { %3703 = vrsqrt.f32 %v1361_v54  ;;  %v1360_v51 = vmul.f32 0.03125, %v1358_v4 }
 0x9ae   :  { %v1362_v9 = vadd.f32 1e-05, %v1360_v51 }
 0x9b0   :  { %3705 = vrsqrt.f32 %v1362_v9 }
 0x9b6   :  { %v3704_v55 = vpop.eup %3703 }
 0x9b7   :  { %v1365_v56 = vmul.f32 %v3704_v55, %v1349_v40  ;;  %v3065_v55 = vld [vmem:[%s4532_s6 + $0x1] ss:$0 sm:$0xff] }
 0x9b9   :  { %v1373_v59 = vmul.f32 %v3023_v57, %v1365_v56 }
 0x9ba   :  { %v3706_v58 = vpop.eup %3705 }
 0x9bb   :  { %v1366_v62 = vmul.f32 %v3706_v58, %v1350_v42  ;;  %v1381_v1 = vadd.f32 %v3024_v63, %v1373_v59 }
 0x9bd   :  { %v1374_v0 = vmul.f32 %v3023_v57, %v1366_v62 }
 0x9bf   :  { %v1382_v2 = vadd.f32 %v3024_v63, %v1374_v0 }
 0x9c1   :  { %v1383_v3 = vpack.c.bf16 %v1382_v2, %v1381_v1 }
 0x9c3   :  { %3382 = vmatmul.mubr.msk.bf16.vlgmr.msra.gmra.mrb[32].mxu0 %vm298_vm4, %v1383_v3 }
 0x9c4   :  { %3401 = vmatprep.mubr.msk.bf16.mxu0 %vm3778_vm3, %v3777_v33  ;;  %3398 = vmatpush3.bf16.msra.mxu0 %v3661_v38 }
 0x9c5   :  { %3399 = vmatprep.subr.bf16.mxu0 %v3777_v33 }
 0x9c8   :  { %3400 = vmatpush3.bf16.msra.mxu0 %v3662_v39 }
 0x9c9   :  { %3405 = vmatprep.subr.bf16.mxu0 %v3777_v33 }
 0xa96   :  { %v1439_v11 = vpop.f32.mrb[32].mxu0 }
 0xa97   :  { %v1440_v12 = vadd.f32 %v3025_v10, %v1439_v11  ;;  %v3383_v13 = vpop.f32.mrb[33].mxu0 }
 0xa98   :  { %v1442_v14 = vpop.f32.mrb[34].mxu0 }
 0xa99   :  { %v1443_v15 = vadd.f32 %v3025_v10, %v1442_v14  ;;  %v3384_v16 = vpop.f32.mrb[35].mxu0  ;;  %v1446_v8 = vmax.f32 %v1440_v12, 0.0 }
 0xa9b   :  { %v1447_v17 = vmax.f32 %v1443_v15, 0.0 }
 0xa9d   :  { %v1448_v18 = vpack.c.bf16 %v1447_v17, %v1446_v8 }
 0xa9f   :  { %3394 = vmatmul.mubr.msk.bf16.vlgmr.msra.gmra.mrb[48].mxu1 %vm1479_vm8, %v1448_v18 }
 0xaa0   :  { %3413 = vmatprep.mubr.msk.bf16.mxu1 %vm3778_vm3, %v3777_v33 }
 0xb72   :  { %v1517_v20 = vpop.f32.mrb[48].mxu1 }
 0xb73   :  { %v1518_v21 = vadd.f32 %v3029_v19, %v1517_v20  ;;  %v3395_v22 = vpop.f32.mrb[49].mxu1 }
 0xb74   :  { %v1520_v60 = vpop.f32.mrb[50].mxu1 }
 0xb75   :  { %v1521_v61 = vadd.f32 %v3029_v19, %v1520_v60  ;;  %v3396_v23 = vpop.f32.mrb[51].mxu1  ;;  %v1524_v24 = vadd.f32 %v1518_v21, %v1381_v1 }
 0xb77   :  { %v1526_v25 = vsel %vm298_vm4, %v1524_v24, 0.0  ;;  %v1525_v26 = vadd.f32 %v1521_v61, %v1382_v2 }
 0xb78   :  { %1527 = vadd.xlane.f32.xlu1 %v1526_v25 }
 0xb79   :  { %v1529_v27 = vsel %vm298_vm4, %v1525_v26, 0.0 }
 0xb7a   :  { %1530 = vadd.xlane.f32.xlu0 %v1529_v27 }
 0xc05   :  { %v1528_v28 = vpop.xlane.xlu1 %1527 }
 0xc06   :  { %v1532_v29 = vmul.f32 0.03125, %v1528_v28 }
 0xc07   :  { %v1531_v30 = vpop.xlane.xlu0 %1530 }
 0xc08   :  { %v1534_v31 = vsub.f32 %v1524_v24, %v1532_v29  ;;  %v1533_v32 = vmul.f32 0.03125, %v1531_v30 }
 0xc0a   :  { %v1535_v5 = vsub.f32 %v1525_v26, %v1533_v32  ;;  %v1536_v34 = vmul.f32 %v1534_v31, %v1534_v31 }
 0xc0c   :  { %v1538_v35 = vsel %vm298_vm4, %v1536_v34, 0.0  ;;  %v1537_v36 = vmul.f32 %v1535_v5, %v1535_v5 }
 0xc0d   :  { %1539 = vadd.xlane.f32.xlu1 %v1538_v35 }
 0xc0e   :  { %v1541_v37 = vsel %vm298_vm4, %v1537_v36, 0.0 }
 0xc0f   :  { %1542 = vadd.xlane.f32.xlu0 %v1541_v37 }
 0xc9a   :  { %v1540_v40 = vpop.xlane.xlu1 %1539 }
 0xc9b   :  { %v1544_v41 = vmul.f32 0.03125, %v1540_v40 }
 0xc9c   :  { %v1543_v42 = vpop.xlane.xlu0 %1542 }
 0xc9d   :  { %v1546_v44 = vadd.f32 1e-05, %v1544_v41  ;;  %v1545_v46 = vmul.f32 0.03125, %v1543_v42 }
 0xc9f   :  { %3707 = vrsqrt.f32 %v1546_v44  ;;  %v1547_v47 = vadd.f32 1e-05, %v1545_v46 }
 0xca1   :  { %3709 = vrsqrt.f32 %v1547_v47 }
 0xca9   :  { %v3708_v45 = vpop.eup %3707 }
 0xcaa   :  { %v1550_v48 = vmul.f32 %v3708_v45, %v1534_v31 }
 0xcab   :  { %v3710_v49 = vpop.eup %3709 }
 0xcac   :  { %v1558_v50 = vmul.f32 %v3035_v43, %v1550_v48  ;;  %v1551_v52 = vmul.f32 %v3710_v49, %v1535_v5 }
 0xcae   :  { %v1559_v54 = vmul.f32 %v3035_v43, %v1551_v52  ;;  %v4239_v4 = vadd.f32 %v3036_v53, %v1558_v50 }
 0xcb0   :  { %v4241_v51 = vadd.f32 %v3036_v53, %v1559_v54 }
 0xcb2   :  { %v1608_v9 = vpack.c.bf16 %v4241_v51, %v4239_v4 }
 0xcb4   :  { %3402 = vmatmul.mubr.msk.bf16.vlgmr.msra.gmra.mrb[36].mxu0 %vm298_vm4, %v1608_v9 }
 0xcb5   :  { %3407 = vmatprep.mubr.msk.bf16.mxu0 %vm3778_vm3, %v3777_v33 }
 0xd87   :  { %v1664_v56 = vpop.f32.mrb[36].mxu0 }
 0xd88   :  { %v3403_v57 = vpop.f32.mrb[37].mxu0  ;;  %v1665_v59 = vadd.f32 %v3065_v55, %v1664_v56 }
 0xd89   :  { %v1667_v58 = vpop.f32.mrb[38].mxu0 }
 0xd8a   :  { %v1668_v62 = vadd.f32 %v3065_v55, %v1667_v58  ;;  %v3404_v63 = vpop.f32.mrb[39].mxu0  ;;  %v1691_v2 = vpack.c.bf16 %v1665_v59, %v1665_v59 }
 0xd8c   :  { %v3626_v0 = vpack.i.bf16 %v1668_v62, %v1665_v59  ;;  %v1692_v1 = vpack.c.bf16 %v1668_v62, %v1668_v62 }
 0xd8e   :  { %3627 = vrot.lane.b32.xlu0 %v3626_v0, %s3781_s0  ;;  %3622 = vrot.lane.b32.xlu1 %v3626_v0, %s3780_s29 }
 0xd92   :  { %3632 = vrot.lane.b32.xlu1 %v3626_v0, %s3779_s2  ;;  %1749 = vrot.lane.b32.xlu0 %v1692_v1, %s3782_s26 }
 0xd96   :  { %1700 = vrot.lane.b32.xlu1 %v1691_v2, %s3782_s26 }
 0xe00   :  { %v3628_v3 = vpop.permute.xlu0 %3627  ;;  %v3623_v6 = vpop.permute.xlu1 %3622 }
 0xe01   :  { %v3625_v7 = vunpack.i.h.bf16 %v3623_v6  ;;  %v3624_v10 = vunpack.i.l.bf16 %v3623_v6  ;;  %v3630_v11 = vunpack.i.h.bf16 %v3628_v3  ;;  %v3629_v12 = vunpack.i.l.bf16 %v3628_v3 }
 0xe03   :  { %v4256_v13 = vpack.c.bf16 %v3625_v7, %v3625_v7  ;;  %v4258_v14 = vpack.c.bf16 %v3624_v10, %v3624_v10  ;;  %v4265_v17 = vpack.c.bf16 %v3630_v11, %v3630_v11  ;;  %v4267_v18 = vpack.c.bf16 %v3629_v12, %v3629_v12 }
 0xe04   :  { %v3633_v15 = vpop.permute.xlu1 %3632  ;;  %v1750_v16 = vpop.permute.xlu0 %1749 }
 0xe05   :  { %v1755_v8 = vsel %vm374_vm5, %v1750_v16, 0  ;;  %1798 = vrot.lane.b32.xlu1 %v4258_v14, %s3782_s26  ;;  %1847 = vrot.lane.b32.xlu0 %v4256_v13, %s3782_s26  ;;  %v3635_v19 = vunpack.i.h.bf16 %v3633_v15  ;;  %v3634_v20 = vunpack.i.l.bf16 %v3633_v15 }
 0xe06   :  { %3412 = vmatpush3.bf16.xpose.msra.mxu1 %v1755_v8 }
 0xe07   :  { %3423 = vmatprep.subr.bf16.mxu1 %v3777_v33  ;;  %v4275_v60 = vpack.c.bf16 %v3635_v19, %v3635_v19  ;;  %v4277_v61 = vpack.c.bf16 %v3634_v20, %v3634_v20 }
 0xe08   :  { %v1701_v21 = vpop.permute.xlu1 %1700 }
 0xe09   :  { %v1706_v22 = vsel %vm374_vm5, %v1701_v21, 0  ;;  %1896 = vrot.lane.b32.xlu1 %v4267_v18, %s3782_s26  ;;  %1945 = vrot.lane.b32.xlu0 %v4265_v17, %s3782_s26 }
 0xe0a   :  { %3406 = vmatpush3.bf16.xpose.msra.mxu0 %v1706_v22 }
 0xe0b   :  { %3417 = vmatprep.subr.bf16.mxu0 %v3777_v33 }
 0xe0d   :  { %1994 = vrot.lane.b32.xlu1 %v4277_v61, %s3782_s26  ;;  %2043 = vrot.lane.b32.xlu0 %v4275_v60, %s3782_s26 }
 0xe0e   :  { %3414 = vmatmul.mubr.msk.bf16.vlgmr.msra.gmra.mrb[52].mxu1 %vm374_vm5, %v1692_v1 }
 0xe0f   :  { %3425 = vmatprep.mubr.msk.bf16.mxu1 %vm3778_vm3, %v3777_v33 }
 0xe11   :  { %3408 = vmatmul.mubr.msk.bf16.vlgmr.msra.gmra.mrb[40].mxu0 %vm374_vm5, %v1691_v2  ;;  %2235 = vrot.lane.b32.xlu1 %v1692_v1, %s3783_s30 }
 0xe12   :  { %2187 = vrot.lane.b32.xlu0 %v1691_v2, %s3783_s30  ;;  %3419 = vmatprep.mubr.msk.bf16.mxu0 %vm3778_vm3, %v3777_v33 }
 0xe77   :  { %v1799_v23 = vpop.permute.xlu1 %1798  ;;  %v1848_v24 = vpop.permute.xlu0 %1847 }
 0xe78   :  { %v1804_v25 = vsel %vm374_vm5, %v1799_v23, 0  ;;  %v1853_v26 = vsel %vm374_vm5, %v1848_v24, 0 }
 0xe79   :  { %3418 = vmatpush3.bf16.xpose.msra.mxu0 %v1804_v25  ;;  %3424 = vmatpush3.bf16.xpose.msra.mxu1 %v1853_v26 }
 0xe7a   :  { %3429 = vmatprep.subr.bf16.mxu0 %v3777_v33  ;;  %3435 = vmatprep.subr.bf16.mxu1 %v3777_v33 }
 0xe7b   :  { %v1897_v27 = vpop.permute.xlu1 %1896  ;;  %v1946_v28 = vpop.permute.xlu0 %1945 }
 0xe7c   :  { %v1902_v29 = vsel %vm374_vm5, %v1897_v27, 0  ;;  %v1951_v30 = vsel %vm374_vm5, %v1946_v28, 0 }
 0xe7f   :  { %v1995_v31 = vpop.permute.xlu1 %1994  ;;  %v2044_v32 = vpop.permute.xlu0 %2043 }
 0xe80   :  { %3420 = vmatmul.mubr.msk.bf16.vlgmr.msra.gmra.mrb[44].mxu0 %vm374_vm5, %v4258_v14  ;;  %3426 = vmatmul.mubr.msk.bf16.vlgmr.msra.gmra.mrb[56].mxu1 %vm374_vm5, %v4256_v13  ;;  %v2000_v5 = vsel %vm374_vm5, %v1995_v31, 0  ;;  %v2049_v34 = vsel %vm374_vm5, %v2044_v32, 0 }
 0xe81   :  { %3430 = vmatpush3.bf16.xpose.msra.mxu0 %v1902_v29  ;;  %3436 = vmatpush3.bf16.xpose.msra.mxu1 %v1951_v30 }
 0xe82   :  { %3431 = vmatprep.mubr.msk.bf16.mxu0 %vm3778_vm3, %v3777_v33  ;;  %3437 = vmatprep.mubr.msk.bf16.mxu1 %vm3778_vm3, %v3777_v33 }
 0xe83   :  { %3441 = vmatprep.subr.bf16.mxu0 %v3777_v33  ;;  %3447 = vmatprep.subr.bf16.mxu1 %v3777_v33  ;;  %v2236_v35 = vpop.permute.xlu1 %2235 }
 0xe84   :  { %v2188_v36 = vpop.permute.xlu0 %2187  ;;  %v2241_v37 = vsel %vm865_vm6, %v2236_v35, 0 }
 0xe85   :  { %v2193_v38 = vsel %vm865_vm6, %v2188_v36, 0 }
 0xe88   :  { %3432 = vmatmul.mubr.msk.bf16.vlgmr.msra.gmra.mrb[48].mxu0 %vm374_vm5, %v4267_v18  ;;  %3438 = vmatmul.mubr.msk.bf16.vlgmr.msra.gmra.mrb[60].mxu1 %vm374_vm5, %v4265_v17 }
 0xe89   :  { %3442 = vmatpush3.bf16.xpose.msra.mxu0 %v2000_v5  ;;  %3448 = vmatpush3.bf16.xpose.msra.mxu1 %v2049_v34 }
 0xe8a   :  { %3443 = vmatprep.mubr.msk.bf16.mxu0 %vm3778_vm3, %v3777_v33  ;;  %3449 = vmatprep.mubr.msk.bf16.mxu1 %vm3778_vm3, %v3777_v33 }
 0xe8b   :  { %3453 = vmatprep.subr.bf16.mxu0 %v3777_v33  ;;  %3459 = vmatprep.subr.bf16.mxu1 %v3777_v33 }
 0xe90   :  { %3444 = vmatmul.mubr.msk.bf16.vlgmr.msra.gmra.mrb[52].mxu0 %vm374_vm5, %v4277_v61  ;;  %3450 = vmatmul.mubr.msk.bf16.vlgmr.msra.gmra.mrb[64].mxu1 %vm374_vm5, %v4275_v60 }
 0xe91   :  { %3454 = vmatpush3.bf16.msra.mxu0 %v2193_v38  ;;  %3460 = vmatpush3.bf16.msra.mxu1 %v2241_v37 }
 0xe92   :  { %3455 = vmatprep.mubr.msk.bf16.mxu0 %vm3778_vm3, %v3777_v33  ;;  %3461 = vmatprep.mubr.msk.bf16.mxu1 %vm3778_vm3, %v3777_v33 }
 0xe93   :  { %3465 = vmatprep.subr.bf16.mxu0 %v3777_v33  ;;  %3471 = vmatprep.subr.bf16.mxu1 %v3777_v33 }
 0xee1   :  { %v1791_v39 = vpop.f32.mrb[52].mxu1 }
 0xee2   :  { %v3415_v40 = vpop.f32.mrb[53].mxu1  ;;  %v2094_v41 = vsel %vm374_vm5, %v1791_v39, -inf }
 0xee3   :  { %2095 = vmax.xlane.f32.xlu0 %v2094_v41  ;;  %v1794_v42 = vpop.f32.mrb[54].mxu1 }
 0xee4   :  { %v3416_v44 = vpop.f32.mrb[55].mxu1  ;;  %v1742_v46 = vpop.f32.mrb[40].mxu0 }
 0xee5   :  { %v3409_v47 = vpop.f32.mrb[41].mxu0  ;;  %v2091_v45 = vsel %vm374_vm5, %v1742_v46, -inf }
 0xee6   :  { %2092 = vmax.xlane.f32.xlu1 %v2091_v45  ;;  %v1745_v43 = vpop.f32.mrb[42].mxu0 }
 0xee7   :  { %v3410_v48 = vpop.f32.mrb[43].mxu0 }
 0xf53   :  { %v1840_v49 = vpop.f32.mrb[44].mxu0  ;;  %v1889_v50 = vpop.f32.mrb[56].mxu1 }
 0xf54   :  { %v3421_v52 = vpop.f32.mrb[45].mxu0  ;;  %v3427_v53 = vpop.f32.mrb[57].mxu1  ;;  %v2097_v54 = vsel %vm374_vm5, %v1840_v49, -inf  ;;  %v2100_v9 = vsel %vm374_vm5, %v1889_v50, -inf }
 0xf55   :  { %v1843_v55 = vpop.f32.mrb[46].mxu0  ;;  %2098 = vmax.xlane.f32.xlu0 %v2097_v54  ;;  %2101 = vmax.xlane.f32.xlu1 %v2100_v9  ;;  %v1892_v56 = vpop.f32.mrb[58].mxu1 }
 0xf56   :  { %v3422_v57 = vpop.f32.mrb[47].mxu0  ;;  %v3428_v58 = vpop.f32.mrb[59].mxu1 }
 0xf5b   :  { %v4336_v59 = vpop.f32.mrb[48].mxu0  ;;  %v1987_v62 = vpop.f32.mrb[60].mxu1 }
 0xf5c   :  { %v3433_v63 = vpop.f32.mrb[49].mxu0  ;;  %v3439_v0 = vpop.f32.mrb[61].mxu1  ;;  %v2103_v1 = vsel %vm374_vm5, %v4336_v59, -inf  ;;  %v2106_v2 = vsel %vm374_vm5, %v1987_v62, -inf }
 0xf5d   :  { %v1941_v3 = vpop.f32.mrb[50].mxu0  ;;  %2104 = vmax.xlane.f32.xlu0 %v2103_v1  ;;  %2107 = vmax.xlane.f32.xlu1 %v2106_v2  ;;  %v1990_v6 = vpop.f32.mrb[62].mxu1 }
 0xf5e   :  { %v3434_v7 = vpop.f32.mrb[51].mxu0  ;;  %v3440_v10 = vpop.f32.mrb[63].mxu1 }
 0xf63   :  { %v4341_v11 = vpop.f32.mrb[52].mxu0  ;;  %v2085_v12 = vpop.f32.mrb[64].mxu1 }
 0xf64   :  { %v3445_v15 = vpop.f32.mrb[53].mxu0  ;;  %v3451_v16 = vpop.f32.mrb[65].mxu1  ;;  %v2109_v8 = vsel %vm374_vm5, %v4341_v11, -inf  ;;  %v2112_v19 = vsel %vm374_vm5, %v2085_v12, -inf }
 0xf65   :  { %v2039_v20 = vpop.f32.mrb[54].mxu0  ;;  %2110 = vmax.xlane.f32.xlu0 %v2109_v8  ;;  %2113 = vmax.xlane.f32.xlu1 %v2112_v19  ;;  %v2088_v21 = vpop.f32.mrb[66].mxu1 }
 0xf66   :  { %v3446_v22 = vpop.f32.mrb[55].mxu0  ;;  %v3452_v23 = vpop.f32.mrb[67].mxu1 }
 0xf70   :  { %v2096_v24 = vpop.xlane.xlu0 %2095 }
 0xf71   :  { %v2116_v26 = vsub.f32 %v1791_v39, %v2096_v24 }
 0xf73   :  { %v2093_v25 = vpop.xlane.xlu1 %2092  ;;  %v2125_v28 = vmul.f32 1.442695, %v2116_v26 }
 0xf74   :  { %v2115_v27 = vsub.f32 %v1742_v46, %v2093_v25 }
 0xf75   :  { %3711 = vpow2.f32 %v2125_v28 }
 0xf76   :  { %2283 = vrot.lane.b32.xlu1 %v4258_v14, %s3783_s30  ;;  %v2123_v29 = vmul.f32 1.442695, %v2115_v27 }
 0xf78   :  { %3713 = vpow2.f32 %v2123_v29 }
 0xf7b   :  { %2331 = vrot.lane.b32.xlu0 %v4256_v13, %s3783_s30 }
 0xf7f   :  { %v3712_v30 = vpop.eup %3711 }
 0xf80   :  { %v2142_v5 = vsel %vm374_vm5, %v3712_v30, 0.0 }
 0xf82   :  { %v3714_v31 = vpop.eup %3713 }
 0xf83   :  { %v2139_v32 = vsel %vm374_vm5, %v3714_v31, 0.0 }
 0xf9a   :  { %2140 = vadd.xlane.f32.xlu0 %v2139_v32  ;;  %2143 = vadd.xlane.f32.xlu1 %v2142_v5 }
 0xfab   :  { %2379 = vrot.lane.b32.xlu1 %v4267_v18, %s3783_s30 }
 0xfe2   :  { %v2099_v13 = vpop.xlane.xlu0 %2098  ;;  %v2102_v14 = vpop.xlane.xlu1 %2101 }
 0xfe3   :  { %v2117_v34 = vsub.f32 %v1840_v49, %v2099_v13  ;;  %v2118_v35 = vsub.f32 %v1889_v50, %v2102_v14 }
 0xfe5   :  { %v2127_v36 = vmul.f32 1.442695, %v2117_v34  ;;  %v2129_v37 = vmul.f32 1.442695, %v2118_v35 }
 0xfe7   :  { %3715 = vpow2.f32 %v2127_v36 }
 0xfe8   :  { %3717 = vpow2.f32 %v2129_v37 }
 0xfea   :  { %v2108_v38 = vpop.xlane.xlu1 %2107  ;;  %v2105_v52 = vpop.xlane.xlu0 %2104 }
 0xfeb   :  { %v2120_v39 = vsub.f32 %v1987_v62, %v2108_v38  ;;  %v2119_v53 = vsub.f32 %v4336_v59, %v2105_v52 }
 0xfed   :  { %v2133_v40 = vmul.f32 1.442695, %v2120_v39  ;;  %v2131_v9 = vmul.f32 1.442695, %v2119_v53 }
 0xfef   :  { %3719 = vpow2.f32 %v2133_v40 }
 0xff1   :  { %v4354_v41 = vpop.eup %3715 }
 0xff2   :  { %v4356_v42 = vpop.eup %3717  ;;  %v2114_v44 = vpop.xlane.xlu1 %2113  ;;  %v2145_v18 = vsel %vm374_vm5, %v4354_v41, 0.0 }
 0xff3   :  { %v2122_v46 = vsub.f32 %v2085_v12, %v2114_v44  ;;  %2146 = vadd.xlane.f32.xlu0 %v2145_v18  ;;  %v2148_v47 = vsel %vm374_vm5, %v4356_v42, 0.0  ;;  %v2111_v54 = vpop.xlane.xlu0 %2110 }
 0xff4   :  { %2149 = vadd.xlane.f32.xlu1 %v2148_v47  ;;  %v2121_v55 = vsub.f32 %v4341_v11, %v2111_v54 }
 0xff5   :  { %v2137_v45 = vmul.f32 1.442695, %v2122_v46 }
 0xff6   :  { %v2135_v56 = vmul.f32 1.442695, %v2121_v55  ;;  %v2284_v58 = vpop.permute.xlu1 %2283 }
 0xff7   :  { %3721 = vpow2.f32 %v2137_v45  ;;  %v2332_v57 = vpop.permute.xlu0 %2331  ;;  %v2289_v11 = vsel %vm865_vm6, %v2284_v58, 0 }
 0xff8   :  { %3723 = vpow2.f32 %v2131_v9  ;;  %v2337_v12 = vsel %vm865_vm6, %v2332_v57, 0 }
 0xff9   :  { %v4362_v43 = vpop.eup %3719  ;;  %3725 = vpow2.f32 %v2135_v56 }
 0xffa   :  { %v2154_v48 = vsel %vm374_vm5, %v4362_v43, 0.0 }
 0xffb   :  { %2155 = vadd.xlane.f32.xlu1 %v2154_v48 }
0x1001   :  { %v4366_v49 = vpop.eup %3721 }
0x1002   :  { %v2160_v50 = vsel %vm374_vm5, %v4366_v49, 0.0  ;;  %v4376_v62 = vpop.eup %3723 }
0x1003   :  { %2161 = vadd.xlane.f32.xlu1 %v2160_v50  ;;  %v4380_v59 = vpop.eup %3725 }
0x1009   :  { %2427 = vrot.lane.b32.xlu0 %v4265_v17, %s3783_s30  ;;  %v2151_v17 = vsel %vm374_vm5, %v4376_v62, 0.0 }
0x1014   :  { %2475 = vrot.lane.b32.xlu1 %v4277_v61, %s3783_s30  ;;  %v2157_v61 = vsel %vm374_vm5, %v4380_v59, 0.0 }
0x1027   :  { %v2141_v63 = vpop.xlane.xlu0 %2140  ;;  %v2144_v0 = vpop.xlane.xlu1 %2143 }
0x1028   :  { %3727 = vrcp.f32 %v2141_v63  ;;  %2152 = vadd.xlane.f32.xlu0 %v2151_v17 }
0x1029   :  { %3729 = vrcp.f32 %v2144_v0 }
0x102b   :  { %v2380_v15 = vpop.permute.xlu1 %2379 }
0x102c   :  { %2158 = vadd.xlane.f32.xlu0 %v2157_v61  ;;  %v2385_v27 = vsel %vm865_vm6, %v2380_v15, 0 }
0x1032   :  { %v3728_v1 = vpop.eup %3727 }
0x1033   :  { %v3730_v2 = vpop.eup %3729  ;;  %v2171_v3 = vmul.f32 %v3728_v1, %v3714_v31  ;;  %v3663_v1 = vld [vmem:[%s4533_s7 + $0x10] sm:$0xff]  }
0x1034   :  { %v2172_v6 = vmul.f32 %v3730_v2, %v3712_v30 }
0x1035   :  { %v2179_v7 = vpack.c.bf16 %v2171_v3, %v2171_v3 }
0x1036   :  { %v2180_v10 = vpack.c.bf16 %v2172_v6, %v2172_v6 }
0x1037   :  { %3456 = vmatmul.mubr.msk.bf16.vlgmr.msra.gmra.mrb[56].mxu0 %vm374_vm5, %v2179_v7 }
0x1038   :  { %3462 = vmatmul.mubr.msk.bf16.vlgmr.msra.gmra.mrb[68].mxu1 %vm374_vm5, %v2180_v10  ;;  %3466 = vmatpush3.bf16.msra.mxu0 %v2289_v11  ;;  %v3664_v11 = vld [vmem:[%s4533_s7 + $0x18] sm:$0xff]  }
0x1039   :  { %3472 = vmatpush3.bf16.msra.mxu1 %v2337_v12  ;;  %3467 = vmatprep.mubr.msk.bf16.mxu0 %vm3778_vm3, %v3777_v33 }
0x103a   :  { %3473 = vmatprep.mubr.msk.bf16.mxu1 %vm3778_vm3, %v3777_v33  ;;  %3477 = vmatprep.subr.bf16.mxu0 %v3777_v33 }
0x103b   :  { %3483 = vmatprep.subr.bf16.mxu1 %v3777_v33 }
0x1042   :  { %2523 = vrot.lane.b32.xlu0 %v4275_v60, %s3783_s30 }
0x1080   :  { %v2147_v16 = vpop.xlane.xlu0 %2146 }
0x1081   :  { %3731 = vrcp.f32 %v2147_v16  ;;  %v2150_v8 = vpop.xlane.xlu1 %2149 }
0x1082   :  { %3733 = vrcp.f32 %v2150_v8 }
0x1084   :  { %v2428_v24 = vpop.permute.xlu0 %2427 }
0x1085   :  { %v2433_v60 = vsel %vm865_vm6, %v2428_v24, 0 }
0x1088   :  { %v2156_v19 = vpop.xlane.xlu1 %2155 }
0x1089   :  { %3735 = vrcp.f32 %v2156_v19 }
0x108b   :  { %v3732_v20 = vpop.eup %3731 }
0x108c   :  { %v3734_v21 = vpop.eup %3733  ;;  %v2173_v22 = vmul.f32 %v3732_v20, %v4354_v41 }
0x108d   :  { %v2174_v23 = vmul.f32 %v3734_v21, %v4356_v42 }
0x108e   :  { %v2181_v25 = vpack.c.bf16 %v2173_v22, %v2173_v22 }
0x108f   :  { %v2182_v26 = vpack.c.bf16 %v2174_v23, %v2174_v23 }
0x1090   :  { %3468 = vmatmul.mubr.msk.bf16.vlgmr.msra.gmra.mrb[60].mxu0 %vm374_vm5, %v2181_v25  ;;  %v2162_v31 = vpop.xlane.xlu1 %2161 }
0x1091   :  { %3474 = vmatmul.mubr.msk.bf16.vlgmr.msra.gmra.mrb[72].mxu1 %vm374_vm5, %v2182_v26  ;;  %3478 = vmatpush3.bf16.msra.mxu0 %v2385_v27  ;;  %3737 = vrcp.f32 %v2162_v31 }
0x1092   :  { %3484 = vmatpush3.bf16.msra.mxu1 %v2433_v60  ;;  %3485 = vmatprep.mubr.msk.bf16.mxu1 %vm3778_vm3, %v3777_v33 }
0x1093   :  { %3495 = vmatprep.subr.bf16.mxu1 %v3777_v33  ;;  %3479 = vmatprep.mubr.msk.bf16.mxu0 %vm3778_vm3, %v3777_v33  ;;  %v3736_v28 = vpop.eup %3735 }
0x1094   :  { %3489 = vmatprep.subr.bf16.mxu0 %v3777_v33  ;;  %v2176_v29 = vmul.f32 %v3736_v28, %v4362_v43  ;;  %v2476_v39 = vpop.permute.xlu1 %2475 }
0x1095   :  { %v2481_v42 = vsel %vm865_vm6, %v2476_v39, 0 }
0x1096   :  { %v2184_v30 = vpack.c.bf16 %v2176_v29, %v2176_v29 }
0x1099   :  { %3486 = vmatmul.mubr.msk.bf16.vlgmr.msra.gmra.mrb[76].mxu1 %vm374_vm5, %v2184_v30 }
0x109a   :  { %3497 = vmatprep.mubr.msk.bf16.mxu1 %vm3778_vm3, %v3777_v33 }
0x109b   :  { %v3738_v5 = vpop.eup %3737 }
0x109c   :  { %v2178_v14 = vmul.f32 %v3738_v5, %v4366_v49 }
0x109e   :  { %v2186_v37 = vpack.c.bf16 %v2178_v14, %v2178_v14 }
0x10b5   :  { %v2153_v32 = vpop.xlane.xlu0 %2152 }
0x10b6   :  { %3739 = vrcp.f32 %v2153_v32 }
0x10b9   :  { %v2159_v13 = vpop.xlane.xlu0 %2158 }
0x10ba   :  { %3741 = vrcp.f32 %v2159_v13 }
0x10bd   :  { %v2524_v34 = vpop.permute.xlu0 %2523 }
0x10be   :  { %v2529_v35 = vsel %vm865_vm6, %v2524_v34, 0 }
0x10bf   :  { %3496 = vmatpush3.bf16.msra.mxu1 %v2529_v35 }
0x10c0   :  { %v3740_v36 = vpop.eup %3739  ;;  %3509 = vmatprep.subr.bf16.mxu1 %v3777_v33 }
0x10c1   :  { %v2175_v38 = vmul.f32 %v3740_v36, %v4376_v62 }
0x10c2   :  { %3498 = vmatmul.mubr.msk.bf16.vlgmr.msra.gmra.mrb[80].mxu1 %vm374_vm5, %v2186_v37  ;;  %v3085_v37 = vld [vmem:[%s4534_s8 + $0x1] ss:$0 sm:$0xff] }
0x10c3   :  { %v2183_v40 = vpack.c.bf16 %v2175_v38, %v2175_v38  ;;  %3513 = vmatprep.mubr.msk.bf16.mxu1 %vm3778_vm3, %v3777_v33 }
0x10c4   :  { %v3742_v41 = vpop.eup %3741 }
0x10c5   :  { %3480 = vmatmul.mubr.msk.bf16.vlgmr.msra.gmra.mrb[64].mxu0 %vm374_vm5, %v2183_v40  ;;  %v2177_v44 = vmul.f32 %v3742_v41, %v4380_v59 }
0x10c6   :  { %3490 = vmatpush3.bf16.msra.mxu0 %v2481_v42  ;;  %3491 = vmatprep.mubr.msk.bf16.mxu0 %vm3778_vm3, %v3777_v33 }
0x10c7   :  { %3501 = vmatprep.subr.bf16.mxu0 %v3777_v33  ;;  %v2185_v18 = vpack.c.bf16 %v2177_v44, %v2177_v44 }
0x10cd   :  { %3492 = vmatmul.mubr.msk.bf16.vlgmr.msra.gmra.mrb[68].mxu0 %vm374_vm5, %v2185_v18 }
0x10ce   :  { %3505 = vmatprep.mubr.msk.bf16.mxu0 %vm3778_vm3, %v3777_v33  ;;  %3502 = vmatpush3.bf16.msra.mxu0 %v3663_v1 }
0x10cf   :  { %3503 = vmatprep.subr.bf16.mxu0 %v3777_v33 }
0x10d2   :  { %3504 = vmatpush3.bf16.msra.mxu0 %v3664_v11  ;;  %v3090_v11 = vld [vmem:[%s4536_s10 + $0x1] ss:$0 sm:$0xff] }
0x10d3   :  { %3517 = vmatprep.subr.bf16.mxu0 %v3777_v33 }
0x110a   :  { %v2229_v46 = vpop.f32.mrb[56].mxu0 }
0x110b   :  { %v2277_v47 = vpop.f32.mrb[68].mxu1  ;;  %v3457_v45 = vpop.f32.mrb[57].mxu0 }
0x110c   :  { %v3463_v43 = vpop.f32.mrb[69].mxu1  ;;  %v2232_v48 = vpop.f32.mrb[58].mxu0 }
0x110d   :  { %v2280_v49 = vpop.f32.mrb[70].mxu1  ;;  %v3458_v50 = vpop.f32.mrb[59].mxu0 }
0x110e   :  { %v3464_v52 = vpop.f32.mrb[71].mxu1 }
0x1163   :  { %v2325_v53 = vpop.f32.mrb[60].mxu0 }
0x1164   :  { %v2373_v54 = vpop.f32.mrb[72].mxu1  ;;  %v3469_v9 = vpop.f32.mrb[61].mxu0 }
0x1165   :  { %v3636_v55 = vpack.i.bf16 %v2373_v54, %v2325_v53  ;;  %v3475_v56 = vpop.f32.mrb[73].mxu1  ;;  %v2328_v57 = vpop.f32.mrb[62].mxu0 }
0x1166   :  { %v2376_v58 = vpop.f32.mrb[74].mxu1  ;;  %v3470_v62 = vpop.f32.mrb[63].mxu0  ;;  %v3666_v56 = vld [vmem:[%s4537_s11 + $0x18] sm:$0xff]   ;;  %v3667_v57 = vld [vmem:[%s4539_s13 + $0x20] sm:$0xff]  }
0x1167   :  { %3637 = vrot.lane.b32.xlu1 %v3636_v55, %s3784_s18  ;;  %v3476_v63 = vpop.f32.mrb[75].mxu1  ;;  %v3668_v58 = vld [vmem:[%s4539_s13 + $0x28] sm:$0xff]  }
0x116c   :  { %v2469_v0 = vpop.f32.mrb[76].mxu1 }
0x116d   :  { %v3487_v17 = vpop.f32.mrb[77].mxu1 }
0x116e   :  { %v2472_v59 = vpop.f32.mrb[78].mxu1 }
0x116f   :  { %v3488_v61 = vpop.f32.mrb[79].mxu1 }
0x1195   :  { %v2565_v2 = vpop.f32.mrb[80].mxu1 }
0x1196   :  { %v3499_v3 = vpop.f32.mrb[81].mxu1 }
0x1197   :  { %v2568_v6 = vpop.f32.mrb[82].mxu1  ;;  %v3089_v3 = vld [vmem:[%s4535_s9 + $0x1] ss:$0 sm:$0xff] }
0x1198   :  { %v2421_v7 = vpop.f32.mrb[64].mxu0  ;;  %v3500_v10 = vpop.f32.mrb[83].mxu1 }
0x1199   :  { %v3641_v12 = vpack.i.bf16 %v2469_v0, %v2421_v7  ;;  %v3481_v15 = vpop.f32.mrb[65].mxu0 }
0x119a   :  { %v2424_v16 = vpop.f32.mrb[66].mxu0 }
0x119b   :  { %v3482_v8 = vpop.f32.mrb[67].mxu0  ;;  %3642 = vrot.lane.b32.xlu0 %v3641_v12, %s3785_s21 }
0x11a0   :  { %v2517_v19 = vpop.f32.mrb[68].mxu0 }
0x11a1   :  { %v3646_v20 = vpack.i.bf16 %v2565_v2, %v2517_v19  ;;  %v3493_v21 = vpop.f32.mrb[69].mxu0  ;;  %v3669_v19 = vld [vmem:[%s4539_s13 + $0x30] sm:$0xff]  }
0x11a2   :  { %v2520_v22 = vpop.f32.mrb[70].mxu0  ;;  %v3091_v21 = vld [vmem:[%s4538_s12 + $0x1] ss:$0 sm:$0xff] }
0x11a3   :  { %v3494_v23 = vpop.f32.mrb[71].mxu0  ;;  %3647 = vrot.lane.b32.xlu1 %v3646_v20, %s3786_s22  ;;  %v3670_v20 = vld [vmem:[%s4539_s13 + $0x38] sm:$0xff]  }
0x11d9   :  { %v3638_v24 = vpop.permute.xlu1 %3637 }
0x11da   :  { %v3640_v26 = vunpack.i.h.bf16 %v3638_v24  ;;  %v3639_v27 = vunpack.i.l.bf16 %v3638_v24 }
0x11dc   :  { %v2596_v30 = vsel %vm374_vm5, %v2277_v47, %v3640_v26  ;;  %v2595_v31 = vsel %vm374_vm5, %v2229_v46, %v3639_v27 }
0x120d   :  { %v3643_v25 = vpop.permute.xlu0 %3642 }
0x120e   :  { %v3645_v60 = vunpack.i.h.bf16 %v3643_v25  ;;  %v3644_v28 = vunpack.i.l.bf16 %v3643_v25 }
0x1210   :  { %v2598_v13 = vsel %vm169_vm2, %v2596_v30, %v3645_v60  ;;  %v2597_v14 = vsel %vm169_vm2, %v2595_v31, %v3644_v28 }
0x1215   :  { %v3648_v29 = vpop.permute.xlu1 %3647 }
0x1216   :  { %v3650_v32 = vunpack.i.h.bf16 %v3648_v29  ;;  %v3649_v5 = vunpack.i.l.bf16 %v3648_v29 }
0x1218   :  { %v2600_v34 = vsel %vm1273_vm7, %v2598_v13, %v3650_v32  ;;  %v2599_v35 = vsel %vm1273_vm7, %v2597_v14, %v3649_v5 }
0x1219   :  { %v2601_v36 = vpack.c.bf16 %v2600_v34, %v2599_v35 }
0x121b   :  { %3506 = vmatmul.mubr.msk.bf16.vlgmr.msra.gmra.mrb[72].mxu0 %vm298_vm4, %v2601_v36 }
0x121c   :  { %3525 = vmatprep.mubr.msk.bf16.mxu0 %vm3778_vm3, %v3777_v33  ;;  %3518 = vmatpush3.bf16.msra.mxu0 %v3667_v57 }
0x121d   :  { %3519 = vmatprep.subr.bf16.mxu0 %v3777_v33 }
0x1220   :  { %3520 = vmatpush3.bf16.msra.mxu0 %v3668_v58  ;;  %v3102_v58 = vld [vmem:[%s4542_s16 + $0x1] ss:$0 sm:$0xff] }
0x1221   :  { %3521 = vmatprep.subr.bf16.mxu0 %v3777_v33 }
0x1224   :  { %3522 = vmatpush3.bf16.msra.mxu0 %v3669_v19 }
0x1225   :  { %3523 = vmatprep.subr.bf16.mxu0 %v3777_v33 }
0x1228   :  { %3524 = vmatpush3.bf16.msra.mxu0 %v3670_v20 }
0x12ee   :  { %v2657_v38 = vpop.f32.mrb[72].mxu0 }
0x12ef   :  { %v2658_v39 = vadd.f32 %v3085_v37, %v2657_v38  ;;  %v3507_v40 = vpop.f32.mrb[73].mxu0 }
0x12f0   :  { %v2660_v41 = vpop.f32.mrb[74].mxu0 }
0x12f1   :  { %v2661_v42 = vadd.f32 %v3085_v37, %v2660_v41  ;;  %v3508_v44 = vpop.f32.mrb[75].mxu0  ;;  %v2664_v18 = vadd.f32 %v2658_v39, %v4239_v4 }
0x12f3   :  { %v2666_v46 = vsel %vm298_vm4, %v2664_v18, 0.0  ;;  %v2665_v47 = vadd.f32 %v2661_v42, %v4241_v51  ;;  %v3665_v51 = vld [vmem:[%s4537_s11 + $0x10] sm:$0xff]  }
0x12f4   :  { %2667 = vadd.xlane.f32.xlu0 %v2666_v46  ;;  %3510 = vmatpush3.bf16.msra.mxu1 %v3665_v51 }
0x12f5   :  { %v2669_v45 = vsel %vm298_vm4, %v2665_v47, 0.0  ;;  %3511 = vmatprep.subr.bf16.mxu1 %v3777_v33  ;;  %v3095_v33 = vld [vmem:[%s4540_s14 + $0x1] ss:$0 sm:$0xff]  ;;  %s4552_s14 = sld [smem:[#allocation7_spill]] }
0x12f6   :  { %2670 = vadd.xlane.f32.xlu1 %v2669_v45 }
0x12f8   :  { %3512 = vmatpush3.bf16.msra.mxu1 %v3666_v56 }
0x1381   :  { %v2668_v43 = vpop.xlane.xlu0 %2667 }
0x1382   :  { %v2672_v48 = vmul.f32 0.03125, %v2668_v43  ;;  %v2892_v43 = vld [vmem:[%s4552_s14] sm:$0xff] }
0x1383   :  { %v2671_v49 = vpop.xlane.xlu1 %2670 }
0x1384   :  { %v2674_v50 = vsub.f32 %v2664_v18, %v2672_v48  ;;  %v2673_v52 = vmul.f32 0.03125, %v2671_v49 }
0x1386   :  { %v2675_v53 = vsub.f32 %v2665_v47, %v2673_v52  ;;  %v2676_v54 = vmul.f32 %v2674_v50, %v2674_v50 }
0x1388   :  { %v2678_v9 = vsel %vm298_vm4, %v2676_v54, 0.0  ;;  %v2677_v55 = vmul.f32 %v2675_v53, %v2675_v53 }
0x1389   :  { %2679 = vadd.xlane.f32.xlu0 %v2678_v9 }
0x138a   :  { %v2681_v4 = vsel %vm298_vm4, %v2677_v55, 0.0  ;;  %v3101_v55 = vld [vmem:[%s4541_s15 + $0x1] ss:$0 sm:$0xff]  ;;  %s3787_s15 = smov [#allocation2]  }
0x138b   :  { %s2982_s21 = sshll.u32 %s3787_s15, 4  ;;  %s2983_s21 = int_to_ptr.vmem [resolvable:$true] %s2982_s21 }
0x138c   :  { %s3751_s16 = scalar_lea.vmem %s2983_s21, 256  ;;  %p3756_p1 = scmp.lt.s32.totalorder %s2983_s21, %s2983_s21 }
0x138d   :  { %2682 = vadd.xlane.f32.xlu0 %v2681_v4  ;;  %p3752_p0 = scmp.ne.s32.totalorder %s2983_s21, %s3751_s16  ;;  %p3757_p2 = scmp.lt.s32.totalorder %s3751_s16, %s3751_s16 }
0x138f   :  { %p3758_p3 = por %p3757_p2, %p3756_p1 }
0x1391   :  { %p3759_p4 = pnand %p3758_p3, %p3752_p0 }
0x1416   :  { %v2680_v62 = vpop.xlane.xlu0 %2679 }
0x1417   :  { %v2684_v63 = vmul.f32 0.03125, %v2680_v62 }
0x1419   :  { %v2686_v0 = vadd.f32 1e-05, %v2684_v63 }
0x141a   :  { %v2683_v17 = vpop.xlane.xlu0 %2682 }
0x141b   :  { %3743 = vrsqrt.f32 %v2686_v0  ;;  %v2685_v59 = vmul.f32 0.03125, %v2683_v17 }
0x141d   :  { %v2687_v61 = vadd.f32 1e-05, %v2685_v59  ;;  %v2893_v59 = vld [vmem:[%s4552_s14 + $0x8] sm:$0xff] }
0x141f   :  { %3745 = vrsqrt.f32 %v2687_v61 }
0x1425   :  { %v3744_v1 = vpop.eup %3743 }
0x1426   :  { %v2690_v2 = vmul.f32 %v3744_v1, %v2674_v50 }
0x1428   :  { %v2698_v7 = vmul.f32 %v3089_v3, %v2690_v2 }
0x1429   :  { %v3746_v6 = vpop.eup %3745 }
0x142a   :  { %v2691_v10 = vmul.f32 %v3746_v6, %v2675_v53  ;;  %v2706_v15 = vadd.f32 %v3090_v11, %v2698_v7 }
0x142c   :  { %v2699_v12 = vmul.f32 %v3089_v3, %v2691_v10 }
0x142e   :  { %v2707_v16 = vadd.f32 %v3090_v11, %v2699_v12 }
0x1430   :  { %v2708_v8 = vpack.c.bf16 %v2707_v16, %v2706_v15 }
0x1432   :  { %3514 = vmatmul.mubr.msk.bf16.vlgmr.msra.gmra.mrb[84].mxu1 %vm298_vm4, %v2708_v8 }
0x1433   :  { %3533 = vmatprep.mubr.msk.f32.mxu1 %vm169_vm2, %v2892_v43 }
0x1505   :  { %v2764_v22 = vpop.f32.mrb[84].mxu1 }
0x1506   :  { %v2765_v23 = vadd.f32 %v3091_v21, %v2764_v22  ;;  %v3515_v24 = vpop.f32.mrb[85].mxu1 }
0x1507   :  { %v2767_v25 = vpop.f32.mrb[86].mxu1 }
0x1508   :  { %v2768_v26 = vadd.f32 %v3091_v21, %v2767_v25  ;;  %v3516_v27 = vpop.f32.mrb[87].mxu1  ;;  %v2771_v60 = vmax.f32 %v2765_v23, 0.0 }
0x150a   :  { %v2772_v28 = vmax.f32 %v2768_v26, 0.0 }
0x150c   :  { %v2773_v29 = vpack.c.bf16 %v2772_v28, %v2771_v60 }
0x150e   :  { %3526 = vmatmul.mubr.msk.bf16.vlgmr.msra.gmra.mrb[76].mxu0 %vm1479_vm8, %v2773_v29 }
0x15e1   :  { %v2841_v30 = vpop.f32.mrb[76].mxu0 }
0x15e2   :  { %v2842_v31 = vadd.f32 %v3095_v33, %v2841_v30  ;;  %v3527_v32 = vpop.f32.mrb[77].mxu0 }
0x15e3   :  { %v2844_v5 = vpop.f32.mrb[78].mxu0 }
0x15e4   :  { %v2845_v13 = vadd.f32 %v3095_v33, %v2844_v5  ;;  %v3528_v14 = vpop.f32.mrb[79].mxu0  ;;  %v2848_v34 = vadd.f32 %v2842_v31, %v2706_v15 }
0x15e6   :  { %v2850_v35 = vsel %vm298_vm4, %v2848_v34, 0.0  ;;  %v2849_v36 = vadd.f32 %v2845_v13, %v2707_v16 }
0x15e7   :  { %2851 = vadd.xlane.f32.xlu1 %v2850_v35 }
0x15e8   :  { %v2853_v37 = vsel %vm298_vm4, %v2849_v36, 0.0 }
0x15e9   :  { %2854 = vadd.xlane.f32.xlu0 %v2853_v37 }
0x1674   :  { %v2852_v38 = vpop.xlane.xlu1 %2851 }
0x1675   :  { %v2856_v39 = vmul.f32 0.03125, %v2852_v38 }
0x1676   :  { %v2855_v40 = vpop.xlane.xlu0 %2854 }
0x1677   :  { %v2858_v41 = vsub.f32 %v2848_v34, %v2856_v39  ;;  %v2857_v42 = vmul.f32 0.03125, %v2855_v40 }
0x1679   :  { %v2859_v44 = vsub.f32 %v2849_v36, %v2857_v42  ;;  %v2860_v18 = vmul.f32 %v2858_v41, %v2858_v41 }
0x167b   :  { %v2862_v46 = vsel %vm298_vm4, %v2860_v18, 0.0  ;;  %v2861_v47 = vmul.f32 %v2859_v44, %v2859_v44 }
0x167c   :  { %2863 = vadd.xlane.f32.xlu1 %v2862_v46 }
0x167d   :  { %v2865_v45 = vsel %vm298_vm4, %v2861_v47, 0.0 }
0x167e   :  { %2866 = vadd.xlane.f32.xlu0 %v2865_v45 }
0x1709   :  { %v2864_v48 = vpop.xlane.xlu1 %2863 }
0x170a   :  { %v2868_v49 = vmul.f32 0.03125, %v2864_v48 }
0x170b   :  { %v2867_v50 = vpop.xlane.xlu0 %2866 }
0x170c   :  { %v2870_v52 = vadd.f32 1e-05, %v2868_v49  ;;  %v2869_v53 = vmul.f32 0.03125, %v2867_v50 }
0x170e   :  { %3747 = vrsqrt.f32 %v2870_v52  ;;  %v2871_v54 = vadd.f32 1e-05, %v2869_v53 }
0x1710   :  { %3749 = vrsqrt.f32 %v2871_v54 }
0x1718   :  { %v3748_v9 = vpop.eup %3747 }
0x1719   :  { %v2874_v4 = vmul.f32 %v3748_v9, %v2858_v41 }
0x171a   :  { %v3750_v51 = vpop.eup %3749 }
0x171b   :  { %v2875_v56 = vmul.f32 %v3750_v51, %v2859_v44  ;;  %v2882_v57 = vmul.f32 %v3101_v55, %v2874_v4 }
0x171d   :  { %v2883_v62 = vmul.f32 %v3101_v55, %v2875_v56  ;;  %v2890_v63 = vadd.f32 %v3102_v58, %v2882_v57 }
0x171f   :  { %v2891_v0 = vadd.f32 %v3102_v58, %v2883_v62 }
0x1721   :  { %v3572_v17 = vpack.c.bf16 %v2891_v0, %v2890_v63 }
0x1723   :  { %3573 = vmatprep.subr.bf16.mxu1 %v3572_v17 }
0x1724   :  { %3575 = vmatpush3.bf16.msra.mxu1 %v3572_v17 }
0x1727   :  { %3534 = vmatmul.mubr.msk.f32.vlgmr.msra.gmra.mrb[2].mxu1 %vm169_vm2, %v2893_v59 }
0x17fa   :  { %v3535_v61 = vpop.f32.mrb[2].mxu1 }
0x17fb   :  { %2976 = vst.msk [vmem:[#allocation2 + $0x8] sm:$0xff] %vm298_vm4, %v3535_v61  ;;  %v2966_v1 = vpop.f32.mrb[3].mxu1 }
0x17fc   :  { %2975 = vst.msk [vmem:[#allocation2] sm:$0xff] %vm298_vm4, %v2966_v1 }
0x17fd   :  { %3762 = shalt.err (!%p3759_p4)
}
0x17fe   :  { %s3763_s24 = scalar_lea.hbm %s4543_s17, 256 }
0x17ff   :  { %p3764_p5 = scmp.ne.s32.totalorder %s4543_s17, %s3763_s24  ;;  %p3767_p6 = scmp.lt.u32.totalorder %s3763_s24, %s4543_s17 }
0x1801   :  { %p3769_p7 = pnand %p3767_p6, %p3764_p5 }
0x1803   :  { %3772 = shalt.err (!%p3769_p7)
}
0x1804   :  { %s3788_s4 = smov 128  }
0x1805   :  { %2988 = dma.vmem_to_hbm [thread:$0]  %s2983_s21, 256, %s4543_s17, [#allocation3], %s3788_s4, %s3788_s4, %s3784_s18  }
0x1806   :  { %3773 = dma.done.wait [#allocation3], 256  }
0x1807   :  { %3774 = vsyncadd [#allocation3], 4294967040 }
0x1808   :  { %2992 = vsyncpa [#allocation3], 1 }

</bundles_post_ra>
